<compile_context>
chip_gen: v7x
topology: tpu7x:2x2x1
jax: 0.10.0
libtpu: 0.0.40
codegen_flags: <defaults>
</compile_context>

<pallas_src>
import functools
import math

import jax
import jax.numpy as jnp
from jax import lax
from jax.experimental import pallas as pl
from jax.experimental.pallas import tpu as pltpu

_PRECISION = lax.Precision.HIGHEST  # for the pure-JAX f32 reference


def _round_up(x, m):
    return (x + m - 1) // m * m


@functools.lru_cache(maxsize=None)
def _vmem_limit_bytes():
    """Scoped-VMEM limit derived from physical per-core capacity.

    v5e/v6e: 128 MiB per TensorCore, v7x: 64 MiB.  The scoped defaults
    (16/32 MiB) are too small for large tiles, so raise the limit explicitly
    while keeping ~25% headroom for compiler-internal scratch.
    """
    try:
        cap = int(pltpu.get_tpu_info().vmem_capacity_bytes)
    except Exception:
        cap = 64 << 20          # conservative (v7x-sized) fallback
    cap = min(cap, 128 << 20)
    return (cap * 3) // 4


def _layer_tile_bytes(tt, b_pad, d_in, h, emit_seq):
    """Rough per-grid-step VMEM footprint for a tt-long time chunk."""
    h4 = 4 * h
    rows = tt * b_pad
    by = 0
    by += 2 * 2 * rows * d_in * 4          # fwd+bwd input chunks (f32 worst case), dbl-buf
    if emit_seq:
        by += 2 * 2 * rows * h * 2         # fwd+bwd bf16 output chunks, dbl-buf
    by += 2 * rows * h4 * 4                # gx scratch (f32, single-buffered)
    by += 2 * 2 * (d_in + h) * h4 * 2      # w_ih + w_hh (bf16), dbl-buf
    by += 2 * 2 * h4 * 4                   # bias, dbl-buf
    by += 4 * b_pad * h * 4                # carried (h, c) state scratch
    by += 2 * 2 * 2 * b_pad * h * 4        # resident h/c output blocks
    return by


def _pick_time_chunk(T, b_pad, d_in, h, requested=None):
    """Largest divisor of T whose tile footprint fits the VMEM budget."""
    # TODO(synk): pad T (masking the tail steps) instead of falling back to
    # small divisors when T is prime / has no convenient divisor.
    budget = (_vmem_limit_bytes() * 2) // 3
    cap = T if requested is None else max(1, min(T, requested))
    best = 1
    for tt in range(1, cap + 1):
        if T % tt == 0 and _layer_tile_bytes(tt, b_pad, d_in, h, True) <= budget:
            best = tt
    return best


# ----------------------------------------------------------------------------
# Pallas kernel: one bidirectional LSTM layer, both directions interleaved.
# grid = (T // Tt,)  -- sequential ("arbitrary") time chunks.
# Per grid step the kernel:
#   1. does one fused bf16 MXU matmul per direction that projects the whole
#      input chunk onto the 4H gate axis (bias folded in) -> VMEM scratch,
#   2. runs Tt recurrent steps for BOTH directions interleaved, carrying
#      (h_f, c_f, h_b, c_b) in the loop carry,
#   3. persists the state in VMEM scratch across chunks and emits the final
#      (h, c) on the last chunk.
# Gate order along 4H is [i | f | o | g] so one sigmoid covers a contiguous
# (B, 3H) slab and one tanh covers (B, H).
# ----------------------------------------------------------------------------
def _make_bilstm_kernel(num_streams, emit_seq, time_chunk, b_pad):
    def kernel(*refs):
        i = 0
        fwd_in = refs[i:i + num_streams]; i += num_streams
        bwd_in = refs[i:i + num_streams]; i += num_streams
        w_ih_ref, w_hh_ref, bias_ref = refs[i:i + 3]; i += 3
        if emit_seq:
            out_f_ref, out_b_ref = refs[i:i + 2]; i += 2
        h_out_ref, c_out_ref = refs[i:i + 2]; i += 2
        gxf_sc, gxb_sc, st_sc = refs[i:i + 3]

        tc = pl.program_id(0)
        n_tc = pl.num_programs(0)
        Tt = time_chunk
        B = b_pad
        H4 = gxf_sc.shape[-1]
        H = H4 // 4

        @pl.when(tc == 0)
        def _init():
            st_sc[...] = jnp.zeros_like(st_sc)

        # ---- fused per-chunk input projection: one bf16 MXU matmul per
        # direction and feature stream, f32 accumulation, bias folded in. ----
        def project(in_refs, d, gx_sc):
            w_all = w_ih_ref[d]                      # (D_in, 4H) bf16
            acc = None
            off = 0
            for r in in_refs:
                x = r[...].astype(jnp.bfloat16)      # (Tt*B, D_s)
                ds = x.shape[-1]
                p = jnp.dot(x, w_all[off:off + ds, :],
                            preferred_element_type=jnp.float32)
                acc = p if acc is None else acc + p
                off += ds
            gx_sc[...] = acc + bias_ref[d:d + 1, :]  # + (b_ih + b_hh)

        project(fwd_in, 0, gxf_sc)
        project(bwd_in, 1, gxb_sc)

        whh_f = w_hh_ref[0]                          # (H, 4H) bf16, hoisted
        whh_b = w_hh_ref[1]

        def lstm_cell(gates, c_prev):
            # sigmoid via the tanh identity (single EUP op per element).
            ifo = 0.5 * jnp.tanh(0.5 * gates[:, :3 * H]) + 0.5
            g = jnp.tanh(gates[:, 3 * H:])
            c_new = ifo[:, H:2 * H] * c_prev + ifo[:, :H] * g
            h_new = ifo[:, 2 * H:] * jnp.tanh(c_new)
            return h_new, c_new

        def step(t, carry):
            h_f, c_f, h_b, c_b = carry
            rf = pl.multiple_of(t * B, B)            # fwd walks 0 .. Tt-1
            rb = pl.multiple_of((Tt - 1 - t) * B, B)  # bwd walks Tt-1 .. 0
            g_f = gxf_sc[pl.ds(rf, B), :] + jnp.dot(
                h_f.astype(jnp.bfloat16), whh_f,
                preferred_element_type=jnp.float32)
            g_b = gxb_sc[pl.ds(rb, B), :] + jnp.dot(
                h_b.astype(jnp.bfloat16), whh_b,
                preferred_element_type=jnp.float32)
            h_f, c_f = lstm_cell(g_f, c_f)
            h_b, c_b = lstm_cell(g_b, c_b)
            if emit_seq:
                out_f_ref[pl.ds(rf, B), :] = h_f.astype(out_f_ref.dtype)
                out_b_ref[pl.ds(rb, B), :] = h_b.astype(out_b_ref.dtype)
            return h_f, c_f, h_b, c_b

        carry = (st_sc[0], st_sc[1], st_sc[2], st_sc[3])
        carry = lax.fori_loop(0, Tt, step, carry, unroll=math.gcd(Tt, 8))
        h_f, c_f, h_b, c_b = carry
        st_sc[0] = h_f
        st_sc[1] = c_f
        st_sc[2] = h_b
        st_sc[3] = c_b

        @pl.when(tc == n_tc - 1)
        def _finalize():
            h_out_ref[0] = h_f
            h_out_ref[1] = h_b
            c_out_ref[0] = c_f
            c_out_ref[1] = c_b

    return kernel


def _run_bilstm_layer(streams, w_ih, w_hh, b, *, T, b_pad, time_chunk,
                      emit_seq):
    """One bidirectional LSTM layer.

    streams : tuple of (T*b_pad, D_s) time-major-flattened feature streams
              whose concat along the last dim is the logical layer input
              (the 2H concat of the previous layer is never materialized).
    Returns (out_f, out_b, h, c) if emit_seq else (h, c); out_* are
    (T*b_pad, H) bf16 hidden sequences in forward-time order, h/c are
    (2, b_pad, H) f32 final states ([fwd, bwd]).
    """
    assert T % time_chunk == 0
    n_tc = T // time_chunk
    rows = time_chunk * b_pad
    H4 = w_hh.shape[2]
    H = H4 // 4
    d_in = w_ih.shape[1]
    assert d_in == sum(s.shape[-1] for s in streams)

    w_ih_bf = w_ih.astype(jnp.bfloat16)
    w_hh_bf = w_hh.astype(jnp.bfloat16)

    kernel = _make_bilstm_kernel(len(streams), emit_seq, time_chunk, b_pad)

    # Each stream is passed twice: once walked forward in time, once backward
    # (pure index arithmetic in the index_map -- no HBM reverse copies).
    fwd_specs = [pl.BlockSpec((rows, s.shape[-1]), lambda t: (t, 0))
                 for s in streams]
    bwd_specs = [pl.BlockSpec((rows, s.shape[-1]), lambda t: (n_tc - 1 - t, 0))
                 for s in streams]
    in_specs = fwd_specs + bwd_specs + [
        pl.BlockSpec((2, d_in, H4), lambda t: (0, 0, 0)),   # w_ih (grid-invariant)
        pl.BlockSpec((2, H, H4), lambda t: (0, 0, 0)),      # w_hh (grid-invariant)
        pl.BlockSpec((2, H4), lambda t: (0, 0)),            # combined bias
    ]

    state = jax.ShapeDtypeStruct((2, b_pad, H), jnp.float32)
    state_spec = pl.BlockSpec((2, b_pad, H), lambda t: (0, 0, 0))
    if emit_seq:
        seq = jax.ShapeDtypeStruct((T * b_pad, H), jnp.bfloat16)
        out_shape = (seq, seq, state, state)
        out_specs = (pl.BlockSpec((rows, H), lambda t: (t, 0)),
                     pl.BlockSpec((rows, H), lambda t: (n_tc - 1 - t, 0)),
                     state_spec, state_spec)
    else:
        # Last layer: the hidden sequence is not consumed -> skip its writeback.
        out_shape = (state, state)
        out_specs = (state_spec, state_spec)

    return pl.pallas_call(
        kernel,
        out_shape=out_shape,
        grid_spec=pltpu.PrefetchScalarGridSpec(
            num_scalar_prefetch=0,
            grid=(n_tc,),
            in_specs=in_specs,
            out_specs=out_specs,
            scratch_shapes=[
                pltpu.VMEM((rows, H4), jnp.float32),     # gx fwd (per chunk)
                pltpu.VMEM((rows, H4), jnp.float32),     # gx bwd (per chunk)
                pltpu.VMEM((4, b_pad, H), jnp.float32),  # carried h_f,c_f,h_b,c_b
            ]),
        compiler_params=pltpu.CompilerParams(
            dimension_semantics=("arbitrary",),
            vmem_limit_bytes=_vmem_limit_bytes()),
    )(*streams, *streams, w_ih_bf, w_hh_bf, b)


# ----------------------------------------------------------------------------
# Encoder forward: stacked bidirectional LSTM; returns (h, c) with shape
# (num_layers * 2, B, H) in PyTorch order [l0_fwd, l0_bwd, l1_fwd, l1_bwd,...].
# ----------------------------------------------------------------------------
def encoder_forward(params, x, time_chunk=None):
    B, T, D = x.shape
    b_pad = _round_up(max(B, 1), 8)        # sublane-align the batch
    x_tm = jnp.transpose(x, (1, 0, 2))     # (T, B, D) time-major
    if b_pad != B:
        x_tm = jnp.pad(x_tm, ((0, 0), (0, b_pad - B), (0, 0)))
    streams = (x_tm.reshape(T * b_pad, D),)

    hs, cs = [], []
    n_layers = len(params)
    for li, (w_ih, w_hh, b) in enumerate(params):
        H = w_hh.shape[1]
        emit_seq = li + 1 < n_layers
        d_in = w_ih.shape[1]
        tt = _pick_time_chunk(T, b_pad, d_in, H, time_chunk)
        res = _run_bilstm_layer(streams, w_ih, w_hh, b, T=T, b_pad=b_pad,
                                time_chunk=tt, emit_seq=emit_seq)
        if emit_seq:
            out_f, out_b, h, c = res
            streams = (out_f, out_b)       # never materialize the 2H concat
        else:
            h, c = res
        hs.append(h[:, :B, :])
        cs.append(c[:, :B, :])
    return jnp.concatenate(hs, axis=0), jnp.concatenate(cs, axis=0)


def init_params(key, input_size, hidden_size, num_layers):
    """U(-1/sqrt(H), 1/sqrt(H)) init, same scheme as PyTorch nn.LSTM.

    Fused/transposed layout for the kernel: w_ih (2, D_layer, 4H),
    w_hh (2, H, 4H), combined bias b_ih + b_hh (2, 4H); leading axis is
    direction [fwd, bwd].  Gate order is [i, f, o, g] (PyTorch stores
    [i, f, g, o]; porting real checkpoints would just permute gate blocks).
    """
    params = []
    scale = 1.0 / math.sqrt(hidden_size)
    H4 = 4 * hidden_size
    for layer in range(num_layers):
        d_in = input_size if layer == 0 else 2 * hidden_size
        key, k1, k2, k3, k4 = jax.random.split(key, 5)
        w_ih = jax.random.uniform(k1, (2, d_in, H4), minval=-scale,
                                  maxval=scale, dtype=jnp.float32)
        w_hh = jax.random.uniform(k2, (2, hidden_size, H4), minval=-scale,
                                  maxval=scale, dtype=jnp.float32)
        b_ih = jax.random.uniform(k3, (2, H4), minval=-scale, maxval=scale,
                                  dtype=jnp.float32)
        b_hh = jax.random.uniform(k4, (2, H4), minval=-scale, maxval=scale,
                                  dtype=jnp.float32)
        params.append((w_ih, w_hh, b_ih + b_hh))
    return params


# ---------------------- pure-JAX f32 reference (for checking) ---------------
def _lstm_ref_dir(x_tm, w_ih, w_hh, b):
    T, B, _ = x_tm.shape
    H = w_hh.shape[0]

    def step(carry, x_t):
        h, c = carry
        gates = (jnp.dot(x_t, w_ih, precision=_PRECISION)
                 + jnp.dot(h, w_hh, precision=_PRECISION) + b)
        i = jax.nn.sigmoid(gates[:, :H])
        f = jax.nn.sigmoid(gates[:, H:2 * H])
        o = jax.nn.sigmoid(gates[:, 2 * H:3 * H])
        g = jnp.tanh(gates[:, 3 * H:])
        c = f * c + i * g
        h = o * jnp.tanh(c)
        return (h, c), h

    init = (jnp.zeros((B, H), jnp.float32), jnp.zeros((B, H), jnp.float32))
    (h, c), out = lax.scan(step, init, x_tm)
    return out, h, c


def encoder_ref(params, x):
    x_tm = jnp.transpose(x, (1, 0, 2))
    inp = x_tm
    hs, cs = [], []
    for (w_ih, w_hh, b) in params:
        of, hf, cf = _lstm_ref_dir(inp, w_ih[0], w_hh[0], b[0])
        ob_r, hb, cb = _lstm_ref_dir(inp[::-1], w_ih[1], w_hh[1], b[1])
        inp = jnp.concatenate([of, ob_r[::-1]], axis=-1)
        hs += [hf, hb]
        cs += [cf, cb]
    return jnp.stack(hs, axis=0), jnp.stack(cs, axis=0)


if __name__ == "__main__":
    batch = 2
    seq = 8
    input_size = 4
    hidden_size = 32
    num_layers = 2

    key = jax.random.PRNGKey(0)
    key, kx, kp = jax.random.split(key, 3)
    x = jax.random.normal(kx, (batch, seq, input_size), dtype=jnp.float32)
    params = init_params(kp, input_size, hidden_size, num_layers)

    # time_chunk=4 -> 2 time chunks: exercises the chunked / carried-state path.
    run = jax.jit(functools.partial(encoder_forward, time_chunk=4))
    h, c = run(params, x)
    jax.block_until_ready((h, c))

    assert h.shape == (num_layers * 2, batch, hidden_size), h.shape
    assert c.shape == (num_layers * 2, batch, hidden_size), c.shape

    h_ref, c_ref = encoder_ref(params, x)
    # bf16 MXU operands + bf16 inter-layer streams vs. the pure-f32 reference.
    assert jnp.allclose(h, h_ref, atol=3e-2, rtol=3e-2), \
        float(jnp.max(jnp.abs(h - h_ref)))
    assert jnp.allclose(c, c_ref, atol=3e-2, rtol=3e-2), \
        float(jnp.max(jnp.abs(c - c_ref)))

    print("KERNEL_OK")
</pallas_src>

<mosaic_0001>
module attributes {stable_mosaic.version = 11 : i64} {
  func.func @kernel(%arg0: i32, %arg1: memref<32x4xf32, #tpu.memory_space<vmem>>, %arg2: memref<32x4xf32, #tpu.memory_space<vmem>>, %arg3: memref<2x4x128xbf16, #tpu.memory_space<vmem>>, %arg4: memref<2x32x128xbf16, #tpu.memory_space<vmem>>, %arg5: memref<2x128xf32, #tpu.memory_space<vmem>>, %arg6: memref<32x32xbf16, #tpu.memory_space<vmem>>, %arg7: memref<32x32xbf16, #tpu.memory_space<vmem>>, %arg8: memref<2x8x32xf32, #tpu.memory_space<vmem>>, %arg9: memref<2x8x32xf32, #tpu.memory_space<vmem>>, %arg10: memref<32x128xf32, #tpu.memory_space<vmem>>, %arg11: memref<32x128xf32, #tpu.memory_space<vmem>>, %arg12: memref<4x8x32xf32, #tpu.memory_space<vmem>>) attributes {dimension_semantics = [#tpu.dimension_semantics<arbitrary>], iteration_bounds = array<i64: 2>, scalar_prefetch = 0 : i64, scratch_operands = 3 : i64, tpu.core_type = #tpu.core_type<tc>, window_params = [{transform_indices = @transform_0, window_bounds = array<i64: 32, 4>}, {transform_indices = @transform_1, window_bounds = array<i64: 32, 4>}, {pipeline_mode = #tpu.pipeline_mode<synchronous>, transform_indices = @transform_2, window_bounds = array<i64: 2, 4, 128>}, {pipeline_mode = #tpu.pipeline_mode<synchronous>, transform_indices = @transform_3, window_bounds = array<i64: 2, 32, 128>}, {pipeline_mode = #tpu.pipeline_mode<synchronous>, transform_indices = @transform_4, window_bounds = array<i64: 2, 128>}, {transform_indices = @transform_5, window_bounds = array<i64: 32, 32>}, {transform_indices = @transform_6, window_bounds = array<i64: 32, 32>}, {pipeline_mode = #tpu.pipeline_mode<synchronous>, transform_indices = @transform_7, window_bounds = array<i64: 2, 8, 32>}, {pipeline_mode = #tpu.pipeline_mode<synchronous>, transform_indices = @transform_8, window_bounds = array<i64: 2, 8, 32>}]} {
    %c0_i32 = arith.constant 0 : i32
    %0 = arith.cmpi eq, %arg0, %c0_i32 : i32
    %1 = arith.extui %0 : i1 to i32
    %c0_i32_0 = arith.constant 0 : i32
    %2 = arith.cmpi ne, %1, %c0_i32_0 : i32
    scf.if %2 {
      %cst_108 = arith.constant 0.000000e+00 : f32
      %276 = vector.broadcast %cst_108 : f32 to vector<4x8x32xf32>
      %c0_109 = arith.constant 0 : index
      %c0_110 = arith.constant 0 : index
      %c0_111 = arith.constant 0 : index
      %277 = vector.load %arg12[%c0_109, %c0_110, %c0_111] : memref<4x8x32xf32, #tpu.memory_space<vmem>>, vector<4x8x32xf32>
      tpu.vector_store %arg12[%c0_109, %c0_110, %c0_111], %276 {strides = array<i32>} : memref<4x8x32xf32, #tpu.memory_space<vmem>>, vector<4x8x32xf32>,
    } else {
    }
    %c0 = arith.constant 0 : index
    %c0_1 = arith.constant 0 : index
    %c0_2 = arith.constant 0 : index
    %3 = vector.load %arg3[%c0, %c0_1, %c0_2] : memref<2x4x128xbf16, #tpu.memory_space<vmem>>, vector<1x4x128xbf16>
    %4 = vector.shape_cast %3 : vector<1x4x128xbf16> to vector<4x128xbf16>
    %c0_3 = arith.constant 0 : index
    %c0_4 = arith.constant 0 : index
    %5 = vector.load %arg1[%c0_3, %c0_4] : memref<32x4xf32, #tpu.memory_space<vmem>>, vector<32x4xf32>
    %6 = arith.truncf %5 : vector<32x4xf32> to vector<32x4xbf16>
    %cst = arith.constant dense<0.000000e+00> : vector<32x128xf32>
    %7 = tpu.matmul %6, %4, %cst {dimension_numbers = #tpu.dot_dimension_numbers<[1], [0], [0], [1], [0, 0, 1, 1], [], []>} : vector<32x4xbf16>, vector<4x128xbf16>, vector<32x128xf32> -> vector<32x128xf32>
    %c0_5 = arith.constant 0 : index
    %c0_6 = arith.constant 0 : index
    %8 = vector.load %arg5[%c0_5, %c0_6] : memref<2x128xf32, #tpu.memory_space<vmem>>, vector<1x128xf32>
    %9 = vector.broadcast %8 : vector<1x128xf32> to vector<32x128xf32>
    %10 = arith.addf %7, %9 : vector<32x128xf32>
    %c0_7 = arith.constant 0 : index
    %c0_8 = arith.constant 0 : index
    %11 = vector.load %arg10[%c0_7, %c0_8] : memref<32x128xf32, #tpu.memory_space<vmem>>, vector<32x128xf32>
    tpu.vector_store %arg10[%c0_7, %c0_8], %10 {strides = array<i32>} : memref<32x128xf32, #tpu.memory_space<vmem>>, vector<32x128xf32>,
    %c1 = arith.constant 1 : index
    %c0_9 = arith.constant 0 : index
    %c0_10 = arith.constant 0 : index
    %12 = vector.load %arg3[%c1, %c0_9, %c0_10] : memref<2x4x128xbf16, #tpu.memory_space<vmem>>, vector<1x4x128xbf16>
    %13 = vector.shape_cast %12 : vector<1x4x128xbf16> to vector<4x128xbf16>
    %c0_11 = arith.constant 0 : index
    %c0_12 = arith.constant 0 : index
    %14 = vector.load %arg2[%c0_11, %c0_12] : memref<32x4xf32, #tpu.memory_space<vmem>>, vector<32x4xf32>
    %15 = arith.truncf %14 : vector<32x4xf32> to vector<32x4xbf16>
    %cst_13 = arith.constant dense<0.000000e+00> : vector<32x128xf32>
    %16 = tpu.matmul %15, %13, %cst_13 {dimension_numbers = #tpu.dot_dimension_numbers<[1], [0], [0], [1], [0, 0, 1, 1], [], []>} : vector<32x4xbf16>, vector<4x128xbf16>, vector<32x128xf32> -> vector<32x128xf32>
    %c1_14 = arith.constant 1 : index
    %c0_15 = arith.constant 0 : index
    %17 = vector.load %arg5[%c1_14, %c0_15] : memref<2x128xf32, #tpu.memory_space<vmem>>, vector<1x128xf32>
    %18 = vector.broadcast %17 : vector<1x128xf32> to vector<32x128xf32>
    %19 = arith.addf %16, %18 : vector<32x128xf32>
    %c0_16 = arith.constant 0 : index
    %c0_17 = arith.constant 0 : index
    %20 = vector.load %arg11[%c0_16, %c0_17] : memref<32x128xf32, #tpu.memory_space<vmem>>, vector<32x128xf32>
    tpu.vector_store %arg11[%c0_16, %c0_17], %19 {strides = array<i32>} : memref<32x128xf32, #tpu.memory_space<vmem>>, vector<32x128xf32>,
    %c0_18 = arith.constant 0 : index
    %c0_19 = arith.constant 0 : index
    %c0_20 = arith.constant 0 : index
    %21 = vector.load %arg4[%c0_18, %c0_19, %c0_20] : memref<2x32x128xbf16, #tpu.memory_space<vmem>>, vector<1x32x128xbf16>
    %22 = vector.shape_cast %21 : vector<1x32x128xbf16> to vector<32x128xbf16>
    %c1_21 = arith.constant 1 : index
    %c0_22 = arith.constant 0 : index
    %c0_23 = arith.constant 0 : index
    %23 = vector.load %arg4[%c1_21, %c0_22, %c0_23] : memref<2x32x128xbf16, #tpu.memory_space<vmem>>, vector<1x32x128xbf16>
    %24 = vector.shape_cast %23 : vector<1x32x128xbf16> to vector<32x128xbf16>
    %c0_24 = arith.constant 0 : index
    %c0_25 = arith.constant 0 : index
    %c0_26 = arith.constant 0 : index
    %25 = vector.load %arg12[%c0_24, %c0_25, %c0_26] : memref<4x8x32xf32, #tpu.memory_space<vmem>>, vector<1x8x32xf32>
    %26 = vector.shape_cast %25 : vector<1x8x32xf32> to vector<8x32xf32>
    %c1_27 = arith.constant 1 : index
    %c0_28 = arith.constant 0 : index
    %c0_29 = arith.constant 0 : index
    %27 = vector.load %arg12[%c1_27, %c0_28, %c0_29] : memref<4x8x32xf32, #tpu.memory_space<vmem>>, vector<1x8x32xf32>
    %28 = vector.shape_cast %27 : vector<1x8x32xf32> to vector<8x32xf32>
    %c2 = arith.constant 2 : index
    %c0_30 = arith.constant 0 : index
    %c0_31 = arith.constant 0 : index
    %29 = vector.load %arg12[%c2, %c0_30, %c0_31] : memref<4x8x32xf32, #tpu.memory_space<vmem>>, vector<1x8x32xf32>
    %30 = vector.shape_cast %29 : vector<1x8x32xf32> to vector<8x32xf32>
    %c3 = arith.constant 3 : index
    %c0_32 = arith.constant 0 : index
    %c0_33 = arith.constant 0 : index
    %31 = vector.load %arg12[%c3, %c0_32, %c0_33] : memref<4x8x32xf32, #tpu.memory_space<vmem>>, vector<1x8x32xf32>
    %32 = vector.shape_cast %31 : vector<1x8x32xf32> to vector<8x32xf32>
    %c0_i32_34 = arith.constant 0 : i32
    %c8_i32 = arith.constant 8 : i32
    %33 = arith.muli %c0_i32_34, %c8_i32 : i32
    %34 = tpu.assume_multiple %33, 8 : i32
    %c3_i32 = arith.constant 3 : i32
    %35 = arith.subi %c3_i32, %c0_i32_34 : i32
    %c8_i32_35 = arith.constant 8 : i32
    %36 = arith.muli %35, %c8_i32_35 : i32
    %37 = tpu.assume_multiple %36, 8 : i32
    %38 = arith.index_cast %34 : i32 to index
    %c0_36 = arith.constant 0 : index
    %39 = vector.load %arg10[%38, %c0_36] : memref<32x128xf32, #tpu.memory_space<vmem>>, vector<8x128xf32>
    %40 = arith.truncf %26 : vector<8x32xf32> to vector<8x32xbf16>
    %cst_37 = arith.constant dense<0.000000e+00> : vector<8x128xf32>
    %41 = tpu.matmul %40, %22, %cst_37 {dimension_numbers = #tpu.dot_dimension_numbers<[1], [0], [0], [1], [0, 0, 1, 1], [], []>} : vector<8x32xbf16>, vector<32x128xbf16>, vector<8x128xf32> -> vector<8x128xf32>
    %42 = arith.addf %39, %41 : vector<8x128xf32>
    %43 = arith.index_cast %37 : i32 to index
    %c0_38 = arith.constant 0 : index
    %44 = vector.load %arg11[%43, %c0_38] : memref<32x128xf32, #tpu.memory_space<vmem>>, vector<8x128xf32>
    %45 = arith.truncf %30 : vector<8x32xf32> to vector<8x32xbf16>
    %cst_39 = arith.constant dense<0.000000e+00> : vector<8x128xf32>
    %46 = tpu.matmul %45, %24, %cst_39 {dimension_numbers = #tpu.dot_dimension_numbers<[1], [0], [0], [1], [0, 0, 1, 1], [], []>} : vector<8x32xbf16>, vector<32x128xbf16>, vector<8x128xf32> -> vector<8x128xf32>
    %47 = arith.addf %44, %46 : vector<8x128xf32>
    %48 = vector.extract_strided_slice %42 {offsets = [0, 0], sizes = [8, 96], strides = [1, 1]} : vector<8x128xf32> to vector<8x96xf32>
    %cst_40 = arith.constant 5.000000e-01 : f32
    %49 = vector.broadcast %cst_40 : f32 to vector<8x96xf32>
    %50 = arith.mulf %49, %48 : vector<8x96xf32>
    %51 = math.tanh %50 : vector<8x96xf32>
    %cst_41 = arith.constant 5.000000e-01 : f32
    %52 = vector.broadcast %cst_41 : f32 to vector<8x96xf32>
    %53 = arith.mulf %52, %51 : vector<8x96xf32>
    %cst_42 = arith.constant 5.000000e-01 : f32
    %54 = vector.broadcast %cst_42 : f32 to vector<8x96xf32>
    %55 = arith.addf %53, %54 : vector<8x96xf32>
    %56 = vector.extract_strided_slice %42 {offsets = [0, 96], sizes = [8, 32], strides = [1, 1]} : vector<8x128xf32> to vector<8x32xf32>
    %57 = math.tanh %56 : vector<8x32xf32>
    %58 = vector.extract_strided_slice %55 {offsets = [0, 32], sizes = [8, 32], strides = [1, 1]} : vector<8x96xf32> to vector<8x32xf32>
    %59 = arith.mulf %58, %28 : vector<8x32xf32>
    %60 = vector.extract_strided_slice %55 {offsets = [0, 0], sizes = [8, 32], strides = [1, 1]} : vector<8x96xf32> to vector<8x32xf32>
    %61 = arith.mulf %60, %57 : vector<8x32xf32>
    %62 = arith.addf %59, %61 : vector<8x32xf32>
    %63 = vector.extract_strided_slice %55 {offsets = [0, 64], sizes = [8, 32], strides = [1, 1]} : vector<8x96xf32> to vector<8x32xf32>
    %64 = math.tanh %62 : vector<8x32xf32>
    %65 = arith.mulf %63, %64 : vector<8x32xf32>
    %66 = vector.extract_strided_slice %47 {offsets = [0, 0], sizes = [8, 96], strides = [1, 1]} : vector<8x128xf32> to vector<8x96xf32>
    %cst_43 = arith.constant 5.000000e-01 : f32
    %67 = vector.broadcast %cst_43 : f32 to vector<8x96xf32>
    %68 = arith.mulf %67, %66 : vector<8x96xf32>
    %69 = math.tanh %68 : vector<8x96xf32>
    %cst_44 = arith.constant 5.000000e-01 : f32
    %70 = vector.broadcast %cst_44 : f32 to vector<8x96xf32>
    %71 = arith.mulf %70, %69 : vector<8x96xf32>
    %cst_45 = arith.constant 5.000000e-01 : f32
    %72 = vector.broadcast %cst_45 : f32 to vector<8x96xf32>
    %73 = arith.addf %71, %72 : vector<8x96xf32>
    %74 = vector.extract_strided_slice %47 {offsets = [0, 96], sizes = [8, 32], strides = [1, 1]} : vector<8x128xf32> to vector<8x32xf32>
    %75 = math.tanh %74 : vector<8x32xf32>
    %76 = vector.extract_strided_slice %73 {offsets = [0, 32], sizes = [8, 32], strides = [1, 1]} : vector<8x96xf32> to vector<8x32xf32>
    %77 = arith.mulf %76, %32 : vector<8x32xf32>
    %78 = vector.extract_strided_slice %73 {offsets = [0, 0], sizes = [8, 32], strides = [1, 1]} : vector<8x96xf32> to vector<8x32xf32>
    %79 = arith.mulf %78, %75 : vector<8x32xf32>
    %80 = arith.addf %77, %79 : vector<8x32xf32>
    %81 = vector.extract_strided_slice %73 {offsets = [0, 64], sizes = [8, 32], strides = [1, 1]} : vector<8x96xf32> to vector<8x32xf32>
    %82 = math.tanh %80 : vector<8x32xf32>
    %83 = arith.mulf %81, %82 : vector<8x32xf32>
    %84 = arith.truncf %65 : vector<8x32xf32> to vector<8x32xbf16>
    %85 = arith.index_cast %34 : i32 to index
    %c0_46 = arith.constant 0 : index
    %86 = vector.load %arg6[%85, %c0_46] : memref<32x32xbf16, #tpu.memory_space<vmem>>, vector<8x32xbf16>
    tpu.vector_store %arg6[%85, %c0_46], %84 {strides = array<i32>} : memref<32x32xbf16, #tpu.memory_space<vmem>>, vector<8x32xbf16>,
    %87 = arith.truncf %83 : vector<8x32xf32> to vector<8x32xbf16>
    %88 = arith.index_cast %37 : i32 to index
    %c0_47 = arith.constant 0 : index
    %89 = vector.load %arg7[%88, %c0_47] : memref<32x32xbf16, #tpu.memory_space<vmem>>, vector<8x32xbf16>
    tpu.vector_store %arg7[%88, %c0_47], %87 {strides = array<i32>} : memref<32x32xbf16, #tpu.memory_space<vmem>>, vector<8x32xbf16>,
    %c1_i32 = arith.constant 1 : i32
    %c8_i32_48 = arith.constant 8 : i32
    %90 = arith.muli %c1_i32, %c8_i32_48 : i32
    %91 = tpu.assume_multiple %90, 8 : i32
    %c3_i32_49 = arith.constant 3 : i32
    %92 = arith.subi %c3_i32_49, %c1_i32 : i32
    %c8_i32_50 = arith.constant 8 : i32
    %93 = arith.muli %92, %c8_i32_50 : i32
    %94 = tpu.assume_multiple %93, 8 : i32
    %95 = arith.index_cast %91 : i32 to index
    %c0_51 = arith.constant 0 : index
    %96 = vector.load %arg10[%95, %c0_51] : memref<32x128xf32, #tpu.memory_space<vmem>>, vector<8x128xf32>
    %97 = arith.truncf %65 : vector<8x32xf32> to vector<8x32xbf16>
    %cst_52 = arith.constant dense<0.000000e+00> : vector<8x128xf32>
    %98 = tpu.matmul %97, %22, %cst_52 {dimension_numbers = #tpu.dot_dimension_numbers<[1], [0], [0], [1], [0, 0, 1, 1], [], []>} : vector<8x32xbf16>, vector<32x128xbf16>, vector<8x128xf32> -> vector<8x128xf32>
    %99 = arith.addf %96, %98 : vector<8x128xf32>
    %100 = arith.index_cast %94 : i32 to index
    %c0_53 = arith.constant 0 : index
    %101 = vector.load %arg11[%100, %c0_53] : memref<32x128xf32, #tpu.memory_space<vmem>>, vector<8x128xf32>
    %102 = arith.truncf %83 : vector<8x32xf32> to vector<8x32xbf16>
    %cst_54 = arith.constant dense<0.000000e+00> : vector<8x128xf32>
    %103 = tpu.matmul %102, %24, %cst_54 {dimension_numbers = #tpu.dot_dimension_numbers<[1], [0], [0], [1], [0, 0, 1, 1], [], []>} : vector<8x32xbf16>, vector<32x128xbf16>, vector<8x128xf32> -> vector<8x128xf32>
    %104 = arith.addf %101, %103 : vector<8x128xf32>
    %105 = vector.extract_strided_slice %99 {offsets = [0, 0], sizes = [8, 96], strides = [1, 1]} : vector<8x128xf32> to vector<8x96xf32>
    %cst_55 = arith.constant 5.000000e-01 : f32
    %106 = vector.broadcast %cst_55 : f32 to vector<8x96xf32>
    %107 = arith.mulf %106, %105 : vector<8x96xf32>
    %108 = math.tanh %107 : vector<8x96xf32>
    %cst_56 = arith.constant 5.000000e-01 : f32
    %109 = vector.broadcast %cst_56 : f32 to vector<8x96xf32>
    %110 = arith.mulf %109, %108 : vector<8x96xf32>
    %cst_57 = arith.constant 5.000000e-01 : f32
    %111 = vector.broadcast %cst_57 : f32 to vector<8x96xf32>
    %112 = arith.addf %110, %111 : vector<8x96xf32>
    %113 = vector.extract_strided_slice %99 {offsets = [0, 96], sizes = [8, 32], strides = [1, 1]} : vector<8x128xf32> to vector<8x32xf32>
    %114 = math.tanh %113 : vector<8x32xf32>
    %115 = vector.extract_strided_slice %112 {offsets = [0, 32], sizes = [8, 32], strides = [1, 1]} : vector<8x96xf32> to vector<8x32xf32>
    %116 = arith.mulf %115, %62 : vector<8x32xf32>
    %117 = vector.extract_strided_slice %112 {offsets = [0, 0], sizes = [8, 32], strides = [1, 1]} : vector<8x96xf32> to vector<8x32xf32>
    %118 = arith.mulf %117, %114 : vector<8x32xf32>
    %119 = arith.addf %116, %118 : vector<8x32xf32>
    %120 = vector.extract_strided_slice %112 {offsets = [0, 64], sizes = [8, 32], strides = [1, 1]} : vector<8x96xf32> to vector<8x32xf32>
    %121 = math.tanh %119 : vector<8x32xf32>
    %122 = arith.mulf %120, %121 : vector<8x32xf32>
    %123 = vector.extract_strided_slice %104 {offsets = [0, 0], sizes = [8, 96], strides = [1, 1]} : vector<8x128xf32> to vector<8x96xf32>
    %cst_58 = arith.constant 5.000000e-01 : f32
    %124 = vector.broadcast %cst_58 : f32 to vector<8x96xf32>
    %125 = arith.mulf %124, %123 : vector<8x96xf32>
    %126 = math.tanh %125 : vector<8x96xf32>
    %cst_59 = arith.constant 5.000000e-01 : f32
    %127 = vector.broadcast %cst_59 : f32 to vector<8x96xf32>
    %128 = arith.mulf %127, %126 : vector<8x96xf32>
    %cst_60 = arith.constant 5.000000e-01 : f32
    %129 = vector.broadcast %cst_60 : f32 to vector<8x96xf32>
    %130 = arith.addf %128, %129 : vector<8x96xf32>
    %131 = vector.extract_strided_slice %104 {offsets = [0, 96], sizes = [8, 32], strides = [1, 1]} : vector<8x128xf32> to vector<8x32xf32>
    %132 = math.tanh %131 : vector<8x32xf32>
    %133 = vector.extract_strided_slice %130 {offsets = [0, 32], sizes = [8, 32], strides = [1, 1]} : vector<8x96xf32> to vector<8x32xf32>
    %134 = arith.mulf %133, %80 : vector<8x32xf32>
    %135 = vector.extract_strided_slice %130 {offsets = [0, 0], sizes = [8, 32], strides = [1, 1]} : vector<8x96xf32> to vector<8x32xf32>
    %136 = arith.mulf %135, %132 : vector<8x32xf32>
    %137 = arith.addf %134, %136 : vector<8x32xf32>
    %138 = vector.extract_strided_slice %130 {offsets = [0, 64], sizes = [8, 32], strides = [1, 1]} : vector<8x96xf32> to vector<8x32xf32>
    %139 = math.tanh %137 : vector<8x32xf32>
    %140 = arith.mulf %138, %139 : vector<8x32xf32>
    %141 = arith.truncf %122 : vector<8x32xf32> to vector<8x32xbf16>
    %142 = arith.index_cast %91 : i32 to index
    %c0_61 = arith.constant 0 : index
    %143 = vector.load %arg6[%142, %c0_61] : memref<32x32xbf16, #tpu.memory_space<vmem>>, vector<8x32xbf16>
    tpu.vector_store %arg6[%142, %c0_61], %141 {strides = array<i32>} : memref<32x32xbf16, #tpu.memory_space<vmem>>, vector<8x32xbf16>,
    %144 = arith.truncf %140 : vector<8x32xf32> to vector<8x32xbf16>
    %145 = arith.index_cast %94 : i32 to index
    %c0_62 = arith.constant 0 : index
    %146 = vector.load %arg7[%145, %c0_62] : memref<32x32xbf16, #tpu.memory_space<vmem>>, vector<8x32xbf16>
    tpu.vector_store %arg7[%145, %c0_62], %144 {strides = array<i32>} : memref<32x32xbf16, #tpu.memory_space<vmem>>, vector<8x32xbf16>,
    %c2_i32 = arith.constant 2 : i32
    %c8_i32_63 = arith.constant 8 : i32
    %147 = arith.muli %c2_i32, %c8_i32_63 : i32
    %148 = tpu.assume_multiple %147, 8 : i32
    %c3_i32_64 = arith.constant 3 : i32
    %149 = arith.subi %c3_i32_64, %c2_i32 : i32
    %c8_i32_65 = arith.constant 8 : i32
    %150 = arith.muli %149, %c8_i32_65 : i32
    %151 = tpu.assume_multiple %150, 8 : i32
    %152 = arith.index_cast %148 : i32 to index
    %c0_66 = arith.constant 0 : index
    %153 = vector.load %arg10[%152, %c0_66] : memref<32x128xf32, #tpu.memory_space<vmem>>, vector<8x128xf32>
    %154 = arith.truncf %122 : vector<8x32xf32> to vector<8x32xbf16>
    %cst_67 = arith.constant dense<0.000000e+00> : vector<8x128xf32>
    %155 = tpu.matmul %154, %22, %cst_67 {dimension_numbers = #tpu.dot_dimension_numbers<[1], [0], [0], [1], [0, 0, 1, 1], [], []>} : vector<8x32xbf16>, vector<32x128xbf16>, vector<8x128xf32> -> vector<8x128xf32>
    %156 = arith.addf %153, %155 : vector<8x128xf32>
    %157 = arith.index_cast %151 : i32 to index
    %c0_68 = arith.constant 0 : index
    %158 = vector.load %arg11[%157, %c0_68] : memref<32x128xf32, #tpu.memory_space<vmem>>, vector<8x128xf32>
    %159 = arith.truncf %140 : vector<8x32xf32> to vector<8x32xbf16>
    %cst_69 = arith.constant dense<0.000000e+00> : vector<8x128xf32>
    %160 = tpu.matmul %159, %24, %cst_69 {dimension_numbers = #tpu.dot_dimension_numbers<[1], [0], [0], [1], [0, 0, 1, 1], [], []>} : vector<8x32xbf16>, vector<32x128xbf16>, vector<8x128xf32> -> vector<8x128xf32>
    %161 = arith.addf %158, %160 : vector<8x128xf32>
    %162 = vector.extract_strided_slice %156 {offsets = [0, 0], sizes = [8, 96], strides = [1, 1]} : vector<8x128xf32> to vector<8x96xf32>
    %cst_70 = arith.constant 5.000000e-01 : f32
    %163 = vector.broadcast %cst_70 : f32 to vector<8x96xf32>
    %164 = arith.mulf %163, %162 : vector<8x96xf32>
    %165 = math.tanh %164 : vector<8x96xf32>
    %cst_71 = arith.constant 5.000000e-01 : f32
    %166 = vector.broadcast %cst_71 : f32 to vector<8x96xf32>
    %167 = arith.mulf %166, %165 : vector<8x96xf32>
    %cst_72 = arith.constant 5.000000e-01 : f32
    %168 = vector.broadcast %cst_72 : f32 to vector<8x96xf32>
    %169 = arith.addf %167, %168 : vector<8x96xf32>
    %170 = vector.extract_strided_slice %156 {offsets = [0, 96], sizes = [8, 32], strides = [1, 1]} : vector<8x128xf32> to vector<8x32xf32>
    %171 = math.tanh %170 : vector<8x32xf32>
    %172 = vector.extract_strided_slice %169 {offsets = [0, 32], sizes = [8, 32], strides = [1, 1]} : vector<8x96xf32> to vector<8x32xf32>
    %173 = arith.mulf %172, %119 : vector<8x32xf32>
    %174 = vector.extract_strided_slice %169 {offsets = [0, 0], sizes = [8, 32], strides = [1, 1]} : vector<8x96xf32> to vector<8x32xf32>
    %175 = arith.mulf %174, %171 : vector<8x32xf32>
    %176 = arith.addf %173, %175 : vector<8x32xf32>
    %177 = vector.extract_strided_slice %169 {offsets = [0, 64], sizes = [8, 32], strides = [1, 1]} : vector<8x96xf32> to vector<8x32xf32>
    %178 = math.tanh %176 : vector<8x32xf32>
    %179 = arith.mulf %177, %178 : vector<8x32xf32>
    %180 = vector.extract_strided_slice %161 {offsets = [0, 0], sizes = [8, 96], strides = [1, 1]} : vector<8x128xf32> to vector<8x96xf32>
    %cst_73 = arith.constant 5.000000e-01 : f32
    %181 = vector.broadcast %cst_73 : f32 to vector<8x96xf32>
    %182 = arith.mulf %181, %180 : vector<8x96xf32>
    %183 = math.tanh %182 : vector<8x96xf32>
    %cst_74 = arith.constant 5.000000e-01 : f32
    %184 = vector.broadcast %cst_74 : f32 to vector<8x96xf32>
    %185 = arith.mulf %184, %183 : vector<8x96xf32>
    %cst_75 = arith.constant 5.000000e-01 : f32
    %186 = vector.broadcast %cst_75 : f32 to vector<8x96xf32>
    %187 = arith.addf %185, %186 : vector<8x96xf32>
    %188 = vector.extract_strided_slice %161 {offsets = [0, 96], sizes = [8, 32], strides = [1, 1]} : vector<8x128xf32> to vector<8x32xf32>
    %189 = math.tanh %188 : vector<8x32xf32>
    %190 = vector.extract_strided_slice %187 {offsets = [0, 32], sizes = [8, 32], strides = [1, 1]} : vector<8x96xf32> to vector<8x32xf32>
    %191 = arith.mulf %190, %137 : vector<8x32xf32>
    %192 = vector.extract_strided_slice %187 {offsets = [0, 0], sizes = [8, 32], strides = [1, 1]} : vector<8x96xf32> to vector<8x32xf32>
    %193 = arith.mulf %192, %189 : vector<8x32xf32>
    %194 = arith.addf %191, %193 : vector<8x32xf32>
    %195 = vector.extract_strided_slice %187 {offsets = [0, 64], sizes = [8, 32], strides = [1, 1]} : vector<8x96xf32> to vector<8x32xf32>
    %196 = math.tanh %194 : vector<8x32xf32>
    %197 = arith.mulf %195, %196 : vector<8x32xf32>
    %198 = arith.truncf %179 : vector<8x32xf32> to vector<8x32xbf16>
    %199 = arith.index_cast %148 : i32 to index
    %c0_76 = arith.constant 0 : index
    %200 = vector.load %arg6[%199, %c0_76] : memref<32x32xbf16, #tpu.memory_space<vmem>>, vector<8x32xbf16>
    tpu.vector_store %arg6[%199, %c0_76], %198 {strides = array<i32>} : memref<32x32xbf16, #tpu.memory_space<vmem>>, vector<8x32xbf16>,
    %201 = arith.truncf %197 : vector<8x32xf32> to vector<8x32xbf16>
    %202 = arith.index_cast %151 : i32 to index
    %c0_77 = arith.constant 0 : index
    %203 = vector.load %arg7[%202, %c0_77] : memref<32x32xbf16, #tpu.memory_space<vmem>>, vector<8x32xbf16>
    tpu.vector_store %arg7[%202, %c0_77], %201 {strides = array<i32>} : memref<32x32xbf16, #tpu.memory_space<vmem>>, vector<8x32xbf16>,
    %c3_i32_78 = arith.constant 3 : i32
    %c8_i32_79 = arith.constant 8 : i32
    %204 = arith.muli %c3_i32_78, %c8_i32_79 : i32
    %205 = tpu.assume_multiple %204, 8 : i32
    %c3_i32_80 = arith.constant 3 : i32
    %206 = arith.subi %c3_i32_80, %c3_i32_78 : i32
    %c8_i32_81 = arith.constant 8 : i32
    %207 = arith.muli %206, %c8_i32_81 : i32
    %208 = tpu.assume_multiple %207, 8 : i32
    %209 = arith.index_cast %205 : i32 to index
    %c0_82 = arith.constant 0 : index
    %210 = vector.load %arg10[%209, %c0_82] : memref<32x128xf32, #tpu.memory_space<vmem>>, vector<8x128xf32>
    %211 = arith.truncf %179 : vector<8x32xf32> to vector<8x32xbf16>
    %cst_83 = arith.constant dense<0.000000e+00> : vector<8x128xf32>
    %212 = tpu.matmul %211, %22, %cst_83 {dimension_numbers = #tpu.dot_dimension_numbers<[1], [0], [0], [1], [0, 0, 1, 1], [], []>} : vector<8x32xbf16>, vector<32x128xbf16>, vector<8x128xf32> -> vector<8x128xf32>
    %213 = arith.addf %210, %212 : vector<8x128xf32>
    %214 = arith.index_cast %208 : i32 to index
    %c0_84 = arith.constant 0 : index
    %215 = vector.load %arg11[%214, %c0_84] : memref<32x128xf32, #tpu.memory_space<vmem>>, vector<8x128xf32>
    %216 = arith.truncf %197 : vector<8x32xf32> to vector<8x32xbf16>
    %cst_85 = arith.constant dense<0.000000e+00> : vector<8x128xf32>
    %217 = tpu.matmul %216, %24, %cst_85 {dimension_numbers = #tpu.dot_dimension_numbers<[1], [0], [0], [1], [0, 0, 1, 1], [], []>} : vector<8x32xbf16>, vector<32x128xbf16>, vector<8x128xf32> -> vector<8x128xf32>
    %218 = arith.addf %215, %217 : vector<8x128xf32>
    %219 = vector.extract_strided_slice %213 {offsets = [0, 0], sizes = [8, 96], strides = [1, 1]} : vector<8x128xf32> to vector<8x96xf32>
    %cst_86 = arith.constant 5.000000e-01 : f32
    %220 = vector.broadcast %cst_86 : f32 to vector<8x96xf32>
    %221 = arith.mulf %220, %219 : vector<8x96xf32>
    %222 = math.tanh %221 : vector<8x96xf32>
    %cst_87 = arith.constant 5.000000e-01 : f32
    %223 = vector.broadcast %cst_87 : f32 to vector<8x96xf32>
    %224 = arith.mulf %223, %222 : vector<8x96xf32>
    %cst_88 = arith.constant 5.000000e-01 : f32
    %225 = vector.broadcast %cst_88 : f32 to vector<8x96xf32>
    %226 = arith.addf %224, %225 : vector<8x96xf32>
    %227 = vector.extract_strided_slice %213 {offsets = [0, 96], sizes = [8, 32], strides = [1, 1]} : vector<8x128xf32> to vector<8x32xf32>
    %228 = math.tanh %227 : vector<8x32xf32>
    %229 = vector.extract_strided_slice %226 {offsets = [0, 32], sizes = [8, 32], strides = [1, 1]} : vector<8x96xf32> to vector<8x32xf32>
    %230 = arith.mulf %229, %176 : vector<8x32xf32>
    %231 = vector.extract_strided_slice %226 {offsets = [0, 0], sizes = [8, 32], strides = [1, 1]} : vector<8x96xf32> to vector<8x32xf32>
    %232 = arith.mulf %231, %228 : vector<8x32xf32>
    %233 = arith.addf %230, %232 : vector<8x32xf32>
    %234 = vector.extract_strided_slice %226 {offsets = [0, 64], sizes = [8, 32], strides = [1, 1]} : vector<8x96xf32> to vector<8x32xf32>
    %235 = math.tanh %233 : vector<8x32xf32>
    %236 = arith.mulf %234, %235 : vector<8x32xf32>
    %237 = vector.extract_strided_slice %218 {offsets = [0, 0], sizes = [8, 96], strides = [1, 1]} : vector<8x128xf32> to vector<8x96xf32>
    %cst_89 = arith.constant 5.000000e-01 : f32
    %238 = vector.broadcast %cst_89 : f32 to vector<8x96xf32>
    %239 = arith.mulf %238, %237 : vector<8x96xf32>
    %240 = math.tanh %239 : vector<8x96xf32>
    %cst_90 = arith.constant 5.000000e-01 : f32
    %241 = vector.broadcast %cst_90 : f32 to vector<8x96xf32>
    %242 = arith.mulf %241, %240 : vector<8x96xf32>
    %cst_91 = arith.constant 5.000000e-01 : f32
    %243 = vector.broadcast %cst_91 : f32 to vector<8x96xf32>
    %244 = arith.addf %242, %243 : vector<8x96xf32>
    %245 = vector.extract_strided_slice %218 {offsets = [0, 96], sizes = [8, 32], strides = [1, 1]} : vector<8x128xf32> to vector<8x32xf32>
    %246 = math.tanh %245 : vector<8x32xf32>
    %247 = vector.extract_strided_slice %244 {offsets = [0, 32], sizes = [8, 32], strides = [1, 1]} : vector<8x96xf32> to vector<8x32xf32>
    %248 = arith.mulf %247, %194 : vector<8x32xf32>
    %249 = vector.extract_strided_slice %244 {offsets = [0, 0], sizes = [8, 32], strides = [1, 1]} : vector<8x96xf32> to vector<8x32xf32>
    %250 = arith.mulf %249, %246 : vector<8x32xf32>
    %251 = arith.addf %248, %250 : vector<8x32xf32>
    %252 = vector.extract_strided_slice %244 {offsets = [0, 64], sizes = [8, 32], strides = [1, 1]} : vector<8x96xf32> to vector<8x32xf32>
    %253 = math.tanh %251 : vector<8x32xf32>
    %254 = arith.mulf %252, %253 : vector<8x32xf32>
    %255 = arith.truncf %236 : vector<8x32xf32> to vector<8x32xbf16>
    %256 = arith.index_cast %205 : i32 to index
    %c0_92 = arith.constant 0 : index
    %257 = vector.load %arg6[%256, %c0_92] : memref<32x32xbf16, #tpu.memory_space<vmem>>, vector<8x32xbf16>
    tpu.vector_store %arg6[%256, %c0_92], %255 {strides = array<i32>} : memref<32x32xbf16, #tpu.memory_space<vmem>>, vector<8x32xbf16>,
    %258 = arith.truncf %254 : vector<8x32xf32> to vector<8x32xbf16>
    %259 = arith.index_cast %208 : i32 to index
    %c0_93 = arith.constant 0 : index
    %260 = vector.load %arg7[%259, %c0_93] : memref<32x32xbf16, #tpu.memory_space<vmem>>, vector<8x32xbf16>
    tpu.vector_store %arg7[%259, %c0_93], %258 {strides = array<i32>} : memref<32x32xbf16, #tpu.memory_space<vmem>>, vector<8x32xbf16>,
    %c4_i32 = arith.constant 4 : i32
    %c0_94 = arith.constant 0 : index
    %c0_95 = arith.constant 0 : index
    %c0_96 = arith.constant 0 : index
    %261 = vector.load %arg12[%c0_94, %c0_95, %c0_96] : memref<4x8x32xf32, #tpu.memory_space<vmem>>, vector<1x8x32xf32>
    %262 = vector.shape_cast %261 : vector<1x8x32xf32> to vector<8x32xf32>
    %263 = vector.shape_cast %236 : vector<8x32xf32> to vector<1x8x32xf32>
    tpu.vector_store %arg12[%c0_94, %c0_95, %c0_96], %263 {strides = array<i32>} : memref<4x8x32xf32, #tpu.memory_space<vmem>>, vector<1x8x32xf32>,
    %c1_97 = arith.constant 1 : index
    %c0_98 = arith.constant 0 : index
    %c0_99 = arith.constant 0 : index
    %264 = vector.load %arg12[%c1_97, %c0_98, %c0_99] : memref<4x8x32xf32, #tpu.memory_space<vmem>>, vector<1x8x32xf32>
    %265 = vector.shape_cast %264 : vector<1x8x32xf32> to vector<8x32xf32>
    %266 = vector.shape_cast %233 : vector<8x32xf32> to vector<1x8x32xf32>
    tpu.vector_store %arg12[%c1_97, %c0_98, %c0_99], %266 {strides = array<i32>} : memref<4x8x32xf32, #tpu.memory_space<vmem>>, vector<1x8x32xf32>,
    %c2_100 = arith.constant 2 : index
    %c0_101 = arith.constant 0 : index
    %c0_102 = arith.constant 0 : index
    %267 = vector.load %arg12[%c2_100, %c0_101, %c0_102] : memref<4x8x32xf32, #tpu.memory_space<vmem>>, vector<1x8x32xf32>
    %268 = vector.shape_cast %267 : vector<1x8x32xf32> to vector<8x32xf32>
    %269 = vector.shape_cast %254 : vector<8x32xf32> to vector<1x8x32xf32>
    tpu.vector_store %arg12[%c2_100, %c0_101, %c0_102], %269 {strides = array<i32>} : memref<4x8x32xf32, #tpu.memory_space<vmem>>, vector<1x8x32xf32>,
    %c3_103 = arith.constant 3 : index
    %c0_104 = arith.constant 0 : index
    %c0_105 = arith.constant 0 : index
    %270 = vector.load %arg12[%c3_103, %c0_104, %c0_105] : memref<4x8x32xf32, #tpu.memory_space<vmem>>, vector<1x8x32xf32>
    %271 = vector.shape_cast %270 : vector<1x8x32xf32> to vector<8x32xf32>
    %272 = vector.shape_cast %251 : vector<8x32xf32> to vector<1x8x32xf32>
    tpu.vector_store %arg12[%c3_103, %c0_104, %c0_105], %272 {strides = array<i32>} : memref<4x8x32xf32, #tpu.memory_space<vmem>>, vector<1x8x32xf32>,
    %c1_i32_106 = arith.constant 1 : i32
    %273 = arith.cmpi eq, %arg0, %c1_i32_106 : i32
    %274 = arith.extui %273 : i1 to i32
    %c0_i32_107 = arith.constant 0 : i32
    %275 = arith.cmpi ne, %274, %c0_i32_107 : i32
    scf.if %275 {
      %c0_108 = arith.constant 0 : index
      %c0_109 = arith.constant 0 : index
      %c0_110 = arith.constant 0 : index
      %276 = vector.load %arg8[%c0_108, %c0_109, %c0_110] : memref<2x8x32xf32, #tpu.memory_space<vmem>>, vector<1x8x32xf32>
      %277 = vector.shape_cast %276 : vector<1x8x32xf32> to vector<8x32xf32>
      %278 = vector.shape_cast %236 : vector<8x32xf32> to vector<1x8x32xf32>
      tpu.vector_store %arg8[%c0_108, %c0_109, %c0_110], %278 {strides = array<i32>} : memref<2x8x32xf32, #tpu.memory_space<vmem>>, vector<1x8x32xf32>,
      %c1_111 = arith.constant 1 : index
      %c0_112 = arith.constant 0 : index
      %c0_113 = arith.constant 0 : index
      %279 = vector.load %arg8[%c1_111, %c0_112, %c0_113] : memref<2x8x32xf32, #tpu.memory_space<vmem>>, vector<1x8x32xf32>
      %280 = vector.shape_cast %279 : vector<1x8x32xf32> to vector<8x32xf32>
      %281 = vector.shape_cast %254 : vector<8x32xf32> to vector<1x8x32xf32>
      tpu.vector_store %arg8[%c1_111, %c0_112, %c0_113], %281 {strides = array<i32>} : memref<2x8x32xf32, #tpu.memory_space<vmem>>, vector<1x8x32xf32>,
      %c0_114 = arith.constant 0 : index
      %c0_115 = arith.constant 0 : index
      %c0_116 = arith.constant 0 : index
      %282 = vector.load %arg9[%c0_114, %c0_115, %c0_116] : memref<2x8x32xf32, #tpu.memory_space<vmem>>, vector<1x8x32xf32>
      %283 = vector.shape_cast %282 : vector<1x8x32xf32> to vector<8x32xf32>
      %284 = vector.shape_cast %233 : vector<8x32xf32> to vector<1x8x32xf32>
      tpu.vector_store %arg9[%c0_114, %c0_115, %c0_116], %284 {strides = array<i32>} : memref<2x8x32xf32, #tpu.memory_space<vmem>>, vector<1x8x32xf32>,
      %c1_117 = arith.constant 1 : index
      %c0_118 = arith.constant 0 : index
      %c0_119 = arith.constant 0 : index
      %285 = vector.load %arg9[%c1_117, %c0_118, %c0_119] : memref<2x8x32xf32, #tpu.memory_space<vmem>>, vector<1x8x32xf32>
      %286 = vector.shape_cast %285 : vector<1x8x32xf32> to vector<8x32xf32>
      %287 = vector.shape_cast %251 : vector<8x32xf32> to vector<1x8x32xf32>
      tpu.vector_store %arg9[%c1_117, %c0_118, %c0_119], %287 {strides = array<i32>} : memref<2x8x32xf32, #tpu.memory_space<vmem>>, vector<1x8x32xf32>,
    } else {
    }
    return
  }
  func.func @transform_0(%arg0: i32) -> (i32, i32) {
    %c0_i32 = arith.constant 0 : i32
    %c0_i32_0 = arith.constant 0 : i32
    return %arg0, %c0_i32 : i32, i32
  }
  func.func @transform_1(%arg0: i32) -> (i32, i32) {
    %c1_i32 = arith.constant 1 : i32
    %0 = arith.subi %c1_i32, %arg0 : i32
    %c0_i32 = arith.constant 0 : i32
    %c0_i32_0 = arith.constant 0 : i32
    return %0, %c0_i32 : i32, i32
  }
  func.func @transform_2(%arg0: i32) -> (i32, i32, i32) {
    %c0_i32 = arith.constant 0 : i32
    %c0_i32_0 = arith.constant 0 : i32
    %c0_i32_1 = arith.constant 0 : i32
    %c0_i32_2 = arith.constant 0 : i32
    return %c0_i32, %c0_i32_0, %c0_i32_1 : i32, i32, i32
  }
  func.func @transform_3(%arg0: i32) -> (i32, i32, i32) {
    %c0_i32 = arith.constant 0 : i32
    %c0_i32_0 = arith.constant 0 : i32
    %c0_i32_1 = arith.constant 0 : i32
    %c0_i32_2 = arith.constant 0 : i32
    return %c0_i32, %c0_i32_0, %c0_i32_1 : i32, i32, i32
  }
  func.func @transform_4(%arg0: i32) -> (i32, i32) {
    %c0_i32 = arith.constant 0 : i32
    %c0_i32_0 = arith.constant 0 : i32
    %c0_i32_1 = arith.constant 0 : i32
    return %c0_i32, %c0_i32_0 : i32, i32
  }
  func.func @transform_5(%arg0: i32) -> (i32, i32) {
    %c0_i32 = arith.constant 0 : i32
    %c0_i32_0 = arith.constant 0 : i32
    return %arg0, %c0_i32 : i32, i32
  }
  func.func @transform_6(%arg0: i32) -> (i32, i32) {
    %c1_i32 = arith.constant 1 : i32
    %0 = arith.subi %c1_i32, %arg0 : i32
    %c0_i32 = arith.constant 0 : i32
    %c0_i32_0 = arith.constant 0 : i32
    return %0, %c0_i32 : i32, i32
  }
  func.func @transform_7(%arg0: i32) -> (i32, i32, i32) {
    %c0_i32 = arith.constant 0 : i32
    %c0_i32_0 = arith.constant 0 : i32
    %c0_i32_1 = arith.constant 0 : i32
    %c0_i32_2 = arith.constant 0 : i32
    return %c0_i32, %c0_i32_0, %c0_i32_1 : i32, i32, i32
  }
  func.func @transform_8(%arg0: i32) -> (i32, i32, i32) {
    %c0_i32 = arith.constant 0 : i32
    %c0_i32_0 = arith.constant 0 : i32
    %c0_i32_1 = arith.constant 0 : i32
    %c0_i32_2 = arith.constant 0 : i32
    return %c0_i32, %c0_i32_0, %c0_i32_1 : i32, i32, i32
  }
}

module attributes {stable_mosaic.version = 11 : i64} {
  func.func @kernel(%arg0: i32, %arg1: memref<32x32xbf16, #tpu.memory_space<vmem>>, %arg2: memref<32x32xbf16, #tpu.memory_space<vmem>>, %arg3: memref<32x32xbf16, #tpu.memory_space<vmem>>, %arg4: memref<32x32xbf16, #tpu.memory_space<vmem>>, %arg5: memref<2x64x128xbf16, #tpu.memory_space<vmem>>, %arg6: memref<2x32x128xbf16, #tpu.memory_space<vmem>>, %arg7: memref<2x128xf32, #tpu.memory_space<vmem>>, %arg8: memref<2x8x32xf32, #tpu.memory_space<vmem>>, %arg9: memref<2x8x32xf32, #tpu.memory_space<vmem>>, %arg10: memref<32x128xf32, #tpu.memory_space<vmem>>, %arg11: memref<32x128xf32, #tpu.memory_space<vmem>>, %arg12: memref<4x8x32xf32, #tpu.memory_space<vmem>>) attributes {dimension_semantics = [#tpu.dimension_semantics<arbitrary>], iteration_bounds = array<i64: 2>, scalar_prefetch = 0 : i64, scratch_operands = 3 : i64, tpu.core_type = #tpu.core_type<tc>, window_params = [{transform_indices = @transform_0, window_bounds = array<i64: 32, 32>}, {transform_indices = @transform_1, window_bounds = array<i64: 32, 32>}, {transform_indices = @transform_2, window_bounds = array<i64: 32, 32>}, {transform_indices = @transform_3, window_bounds = array<i64: 32, 32>}, {pipeline_mode = #tpu.pipeline_mode<synchronous>, transform_indices = @transform_4, window_bounds = array<i64: 2, 64, 128>}, {pipeline_mode = #tpu.pipeline_mode<synchronous>, transform_indices = @transform_5, window_bounds = array<i64: 2, 32, 128>}, {pipeline_mode = #tpu.pipeline_mode<synchronous>, transform_indices = @transform_6, window_bounds = array<i64: 2, 128>}, {pipeline_mode = #tpu.pipeline_mode<synchronous>, transform_indices = @transform_7, window_bounds = array<i64: 2, 8, 32>}, {pipeline_mode = #tpu.pipeline_mode<synchronous>, transform_indices = @transform_8, window_bounds = array<i64: 2, 8, 32>}]} {
    %c0_i32 = arith.constant 0 : i32
    %0 = arith.cmpi eq, %arg0, %c0_i32 : i32
    %1 = arith.extui %0 : i1 to i32
    %c0_i32_0 = arith.constant 0 : i32
    %2 = arith.cmpi ne, %1, %c0_i32_0 : i32
    scf.if %2 {
      %cst_106 = arith.constant 0.000000e+00 : f32
      %260 = vector.broadcast %cst_106 : f32 to vector<4x8x32xf32>
      %c0_107 = arith.constant 0 : index
      %c0_108 = arith.constant 0 : index
      %c0_109 = arith.constant 0 : index
      %261 = vector.load %arg12[%c0_107, %c0_108, %c0_109] : memref<4x8x32xf32, #tpu.memory_space<vmem>>, vector<4x8x32xf32>
      tpu.vector_store %arg12[%c0_107, %c0_108, %c0_109], %260 {strides = array<i32>} : memref<4x8x32xf32, #tpu.memory_space<vmem>>, vector<4x8x32xf32>,
    } else {
    }
    %c0 = arith.constant 0 : index
    %c0_1 = arith.constant 0 : index
    %c0_2 = arith.constant 0 : index
    %3 = vector.load %arg5[%c0, %c0_1, %c0_2] : memref<2x64x128xbf16, #tpu.memory_space<vmem>>, vector<1x64x128xbf16>
    %4 = vector.shape_cast %3 : vector<1x64x128xbf16> to vector<64x128xbf16>
    %c0_3 = arith.constant 0 : index
    %c0_4 = arith.constant 0 : index
    %5 = vector.load %arg1[%c0_3, %c0_4] : memref<32x32xbf16, #tpu.memory_space<vmem>>, vector<32x32xbf16>
    %6 = vector.extract_strided_slice %4 {offsets = [0, 0], sizes = [32, 128], strides = [1, 1]} : vector<64x128xbf16> to vector<32x128xbf16>
    %cst = arith.constant dense<0.000000e+00> : vector<32x128xf32>
    %7 = tpu.matmul %5, %6, %cst {dimension_numbers = #tpu.dot_dimension_numbers<[1], [0], [0], [1], [0, 0, 1, 1], [], []>} : vector<32x32xbf16>, vector<32x128xbf16>, vector<32x128xf32> -> vector<32x128xf32>
    %c0_5 = arith.constant 0 : index
    %c0_6 = arith.constant 0 : index
    %8 = vector.load %arg2[%c0_5, %c0_6] : memref<32x32xbf16, #tpu.memory_space<vmem>>, vector<32x32xbf16>
    %9 = vector.extract_strided_slice %4 {offsets = [32, 0], sizes = [32, 128], strides = [1, 1]} : vector<64x128xbf16> to vector<32x128xbf16>
    %cst_7 = arith.constant dense<0.000000e+00> : vector<32x128xf32>
    %10 = tpu.matmul %8, %9, %cst_7 {dimension_numbers = #tpu.dot_dimension_numbers<[1], [0], [0], [1], [0, 0, 1, 1], [], []>} : vector<32x32xbf16>, vector<32x128xbf16>, vector<32x128xf32> -> vector<32x128xf32>
    %11 = arith.addf %7, %10 : vector<32x128xf32>
    %c0_8 = arith.constant 0 : index
    %c0_9 = arith.constant 0 : index
    %12 = vector.load %arg7[%c0_8, %c0_9] : memref<2x128xf32, #tpu.memory_space<vmem>>, vector<1x128xf32>
    %13 = vector.broadcast %12 : vector<1x128xf32> to vector<32x128xf32>
    %14 = arith.addf %11, %13 : vector<32x128xf32>
    %c0_10 = arith.constant 0 : index
    %c0_11 = arith.constant 0 : index
    %15 = vector.load %arg10[%c0_10, %c0_11] : memref<32x128xf32, #tpu.memory_space<vmem>>, vector<32x128xf32>
    tpu.vector_store %arg10[%c0_10, %c0_11], %14 {strides = array<i32>} : memref<32x128xf32, #tpu.memory_space<vmem>>, vector<32x128xf32>,
    %c1 = arith.constant 1 : index
    %c0_12 = arith.constant 0 : index
    %c0_13 = arith.constant 0 : index
    %16 = vector.load %arg5[%c1, %c0_12, %c0_13] : memref<2x64x128xbf16, #tpu.memory_space<vmem>>, vector<1x64x128xbf16>
    %17 = vector.shape_cast %16 : vector<1x64x128xbf16> to vector<64x128xbf16>
    %c0_14 = arith.constant 0 : index
    %c0_15 = arith.constant 0 : index
    %18 = vector.load %arg3[%c0_14, %c0_15] : memref<32x32xbf16, #tpu.memory_space<vmem>>, vector<32x32xbf16>
    %19 = vector.extract_strided_slice %17 {offsets = [0, 0], sizes = [32, 128], strides = [1, 1]} : vector<64x128xbf16> to vector<32x128xbf16>
    %cst_16 = arith.constant dense<0.000000e+00> : vector<32x128xf32>
    %20 = tpu.matmul %18, %19, %cst_16 {dimension_numbers = #tpu.dot_dimension_numbers<[1], [0], [0], [1], [0, 0, 1, 1], [], []>} : vector<32x32xbf16>, vector<32x128xbf16>, vector<32x128xf32> -> vector<32x128xf32>
    %c0_17 = arith.constant 0 : index
    %c0_18 = arith.constant 0 : index
    %21 = vector.load %arg4[%c0_17, %c0_18] : memref<32x32xbf16, #tpu.memory_space<vmem>>, vector<32x32xbf16>
    %22 = vector.extract_strided_slice %17 {offsets = [32, 0], sizes = [32, 128], strides = [1, 1]} : vector<64x128xbf16> to vector<32x128xbf16>
    %cst_19 = arith.constant dense<0.000000e+00> : vector<32x128xf32>
    %23 = tpu.matmul %21, %22, %cst_19 {dimension_numbers = #tpu.dot_dimension_numbers<[1], [0], [0], [1], [0, 0, 1, 1], [], []>} : vector<32x32xbf16>, vector<32x128xbf16>, vector<32x128xf32> -> vector<32x128xf32>
    %24 = arith.addf %20, %23 : vector<32x128xf32>
    %c1_20 = arith.constant 1 : index
    %c0_21 = arith.constant 0 : index
    %25 = vector.load %arg7[%c1_20, %c0_21] : memref<2x128xf32, #tpu.memory_space<vmem>>, vector<1x128xf32>
    %26 = vector.broadcast %25 : vector<1x128xf32> to vector<32x128xf32>
    %27 = arith.addf %24, %26 : vector<32x128xf32>
    %c0_22 = arith.constant 0 : index
    %c0_23 = arith.constant 0 : index
    %28 = vector.load %arg11[%c0_22, %c0_23] : memref<32x128xf32, #tpu.memory_space<vmem>>, vector<32x128xf32>
    tpu.vector_store %arg11[%c0_22, %c0_23], %27 {strides = array<i32>} : memref<32x128xf32, #tpu.memory_space<vmem>>, vector<32x128xf32>,
    %c0_24 = arith.constant 0 : index
    %c0_25 = arith.constant 0 : index
    %c0_26 = arith.constant 0 : index
    %29 = vector.load %arg6[%c0_24, %c0_25, %c0_26] : memref<2x32x128xbf16, #tpu.memory_space<vmem>>, vector<1x32x128xbf16>
    %30 = vector.shape_cast %29 : vector<1x32x128xbf16> to vector<32x128xbf16>
    %c1_27 = arith.constant 1 : index
    %c0_28 = arith.constant 0 : index
    %c0_29 = arith.constant 0 : index
    %31 = vector.load %arg6[%c1_27, %c0_28, %c0_29] : memref<2x32x128xbf16, #tpu.memory_space<vmem>>, vector<1x32x128xbf16>
    %32 = vector.shape_cast %31 : vector<1x32x128xbf16> to vector<32x128xbf16>
    %c0_30 = arith.constant 0 : index
    %c0_31 = arith.constant 0 : index
    %c0_32 = arith.constant 0 : index
    %33 = vector.load %arg12[%c0_30, %c0_31, %c0_32] : memref<4x8x32xf32, #tpu.memory_space<vmem>>, vector<1x8x32xf32>
    %34 = vector.shape_cast %33 : vector<1x8x32xf32> to vector<8x32xf32>
    %c1_33 = arith.constant 1 : index
    %c0_34 = arith.constant 0 : index
    %c0_35 = arith.constant 0 : index
    %35 = vector.load %arg12[%c1_33, %c0_34, %c0_35] : memref<4x8x32xf32, #tpu.memory_space<vmem>>, vector<1x8x32xf32>
    %36 = vector.shape_cast %35 : vector<1x8x32xf32> to vector<8x32xf32>
    %c2 = arith.constant 2 : index
    %c0_36 = arith.constant 0 : index
    %c0_37 = arith.constant 0 : index
    %37 = vector.load %arg12[%c2, %c0_36, %c0_37] : memref<4x8x32xf32, #tpu.memory_space<vmem>>, vector<1x8x32xf32>
    %38 = vector.shape_cast %37 : vector<1x8x32xf32> to vector<8x32xf32>
    %c3 = arith.constant 3 : index
    %c0_38 = arith.constant 0 : index
    %c0_39 = arith.constant 0 : index
    %39 = vector.load %arg12[%c3, %c0_38, %c0_39] : memref<4x8x32xf32, #tpu.memory_space<vmem>>, vector<1x8x32xf32>
    %40 = vector.shape_cast %39 : vector<1x8x32xf32> to vector<8x32xf32>
    %c0_i32_40 = arith.constant 0 : i32
    %c8_i32 = arith.constant 8 : i32
    %41 = arith.muli %c0_i32_40, %c8_i32 : i32
    %42 = tpu.assume_multiple %41, 8 : i32
    %c3_i32 = arith.constant 3 : i32
    %43 = arith.subi %c3_i32, %c0_i32_40 : i32
    %c8_i32_41 = arith.constant 8 : i32
    %44 = arith.muli %43, %c8_i32_41 : i32
    %45 = tpu.assume_multiple %44, 8 : i32
    %46 = arith.index_cast %42 : i32 to index
    %c0_42 = arith.constant 0 : index
    %47 = vector.load %arg10[%46, %c0_42] : memref<32x128xf32, #tpu.memory_space<vmem>>, vector<8x128xf32>
    %48 = arith.truncf %34 : vector<8x32xf32> to vector<8x32xbf16>
    %cst_43 = arith.constant dense<0.000000e+00> : vector<8x128xf32>
    %49 = tpu.matmul %48, %30, %cst_43 {dimension_numbers = #tpu.dot_dimension_numbers<[1], [0], [0], [1], [0, 0, 1, 1], [], []>} : vector<8x32xbf16>, vector<32x128xbf16>, vector<8x128xf32> -> vector<8x128xf32>
    %50 = arith.addf %47, %49 : vector<8x128xf32>
    %51 = arith.index_cast %45 : i32 to index
    %c0_44 = arith.constant 0 : index
    %52 = vector.load %arg11[%51, %c0_44] : memref<32x128xf32, #tpu.memory_space<vmem>>, vector<8x128xf32>
    %53 = arith.truncf %38 : vector<8x32xf32> to vector<8x32xbf16>
    %cst_45 = arith.constant dense<0.000000e+00> : vector<8x128xf32>
    %54 = tpu.matmul %53, %32, %cst_45 {dimension_numbers = #tpu.dot_dimension_numbers<[1], [0], [0], [1], [0, 0, 1, 1], [], []>} : vector<8x32xbf16>, vector<32x128xbf16>, vector<8x128xf32> -> vector<8x128xf32>
    %55 = arith.addf %52, %54 : vector<8x128xf32>
    %56 = vector.extract_strided_slice %50 {offsets = [0, 0], sizes = [8, 96], strides = [1, 1]} : vector<8x128xf32> to vector<8x96xf32>
    %cst_46 = arith.constant 5.000000e-01 : f32
    %57 = vector.broadcast %cst_46 : f32 to vector<8x96xf32>
    %58 = arith.mulf %57, %56 : vector<8x96xf32>
    %59 = math.tanh %58 : vector<8x96xf32>
    %cst_47 = arith.constant 5.000000e-01 : f32
    %60 = vector.broadcast %cst_47 : f32 to vector<8x96xf32>
    %61 = arith.mulf %60, %59 : vector<8x96xf32>
    %cst_48 = arith.constant 5.000000e-01 : f32
    %62 = vector.broadcast %cst_48 : f32 to vector<8x96xf32>
    %63 = arith.addf %61, %62 : vector<8x96xf32>
    %64 = vector.extract_strided_slice %50 {offsets = [0, 96], sizes = [8, 32], strides = [1, 1]} : vector<8x128xf32> to vector<8x32xf32>
    %65 = math.tanh %64 : vector<8x32xf32>
    %66 = vector.extract_strided_slice %63 {offsets = [0, 32], sizes = [8, 32], strides = [1, 1]} : vector<8x96xf32> to vector<8x32xf32>
    %67 = arith.mulf %66, %36 : vector<8x32xf32>
    %68 = vector.extract_strided_slice %63 {offsets = [0, 0], sizes = [8, 32], strides = [1, 1]} : vector<8x96xf32> to vector<8x32xf32>
    %69 = arith.mulf %68, %65 : vector<8x32xf32>
    %70 = arith.addf %67, %69 : vector<8x32xf32>
    %71 = vector.extract_strided_slice %63 {offsets = [0, 64], sizes = [8, 32], strides = [1, 1]} : vector<8x96xf32> to vector<8x32xf32>
    %72 = math.tanh %70 : vector<8x32xf32>
    %73 = arith.mulf %71, %72 : vector<8x32xf32>
    %74 = vector.extract_strided_slice %55 {offsets = [0, 0], sizes = [8, 96], strides = [1, 1]} : vector<8x128xf32> to vector<8x96xf32>
    %cst_49 = arith.constant 5.000000e-01 : f32
    %75 = vector.broadcast %cst_49 : f32 to vector<8x96xf32>
    %76 = arith.mulf %75, %74 : vector<8x96xf32>
    %77 = math.tanh %76 : vector<8x96xf32>
    %cst_50 = arith.constant 5.000000e-01 : f32
    %78 = vector.broadcast %cst_50 : f32 to vector<8x96xf32>
    %79 = arith.mulf %78, %77 : vector<8x96xf32>
    %cst_51 = arith.constant 5.000000e-01 : f32
    %80 = vector.broadcast %cst_51 : f32 to vector<8x96xf32>
    %81 = arith.addf %79, %80 : vector<8x96xf32>
    %82 = vector.extract_strided_slice %55 {offsets = [0, 96], sizes = [8, 32], strides = [1, 1]} : vector<8x128xf32> to vector<8x32xf32>
    %83 = math.tanh %82 : vector<8x32xf32>
    %84 = vector.extract_strided_slice %81 {offsets = [0, 32], sizes = [8, 32], strides = [1, 1]} : vector<8x96xf32> to vector<8x32xf32>
    %85 = arith.mulf %84, %40 : vector<8x32xf32>
    %86 = vector.extract_strided_slice %81 {offsets = [0, 0], sizes = [8, 32], strides = [1, 1]} : vector<8x96xf32> to vector<8x32xf32>
    %87 = arith.mulf %86, %83 : vector<8x32xf32>
    %88 = arith.addf %85, %87 : vector<8x32xf32>
    %89 = vector.extract_strided_slice %81 {offsets = [0, 64], sizes = [8, 32], strides = [1, 1]} : vector<8x96xf32> to vector<8x32xf32>
    %90 = math.tanh %88 : vector<8x32xf32>
    %91 = arith.mulf %89, %90 : vector<8x32xf32>
    %c1_i32 = arith.constant 1 : i32
    %c8_i32_52 = arith.constant 8 : i32
    %92 = arith.muli %c1_i32, %c8_i32_52 : i32
    %93 = tpu.assume_multiple %92, 8 : i32
    %c3_i32_53 = arith.constant 3 : i32
    %94 = arith.subi %c3_i32_53, %c1_i32 : i32
    %c8_i32_54 = arith.constant 8 : i32
    %95 = arith.muli %94, %c8_i32_54 : i32
    %96 = tpu.assume_multiple %95, 8 : i32
    %97 = arith.index_cast %93 : i32 to index
    %c0_55 = arith.constant 0 : index
    %98 = vector.load %arg10[%97, %c0_55] : memref<32x128xf32, #tpu.memory_space<vmem>>, vector<8x128xf32>
    %99 = arith.truncf %73 : vector<8x32xf32> to vector<8x32xbf16>
    %cst_56 = arith.constant dense<0.000000e+00> : vector<8x128xf32>
    %100 = tpu.matmul %99, %30, %cst_56 {dimension_numbers = #tpu.dot_dimension_numbers<[1], [0], [0], [1], [0, 0, 1, 1], [], []>} : vector<8x32xbf16>, vector<32x128xbf16>, vector<8x128xf32> -> vector<8x128xf32>
    %101 = arith.addf %98, %100 : vector<8x128xf32>
    %102 = arith.index_cast %96 : i32 to index
    %c0_57 = arith.constant 0 : index
    %103 = vector.load %arg11[%102, %c0_57] : memref<32x128xf32, #tpu.memory_space<vmem>>, vector<8x128xf32>
    %104 = arith.truncf %91 : vector<8x32xf32> to vector<8x32xbf16>
    %cst_58 = arith.constant dense<0.000000e+00> : vector<8x128xf32>
    %105 = tpu.matmul %104, %32, %cst_58 {dimension_numbers = #tpu.dot_dimension_numbers<[1], [0], [0], [1], [0, 0, 1, 1], [], []>} : vector<8x32xbf16>, vector<32x128xbf16>, vector<8x128xf32> -> vector<8x128xf32>
    %106 = arith.addf %103, %105 : vector<8x128xf32>
    %107 = vector.extract_strided_slice %101 {offsets = [0, 0], sizes = [8, 96], strides = [1, 1]} : vector<8x128xf32> to vector<8x96xf32>
    %cst_59 = arith.constant 5.000000e-01 : f32
    %108 = vector.broadcast %cst_59 : f32 to vector<8x96xf32>
    %109 = arith.mulf %108, %107 : vector<8x96xf32>
    %110 = math.tanh %109 : vector<8x96xf32>
    %cst_60 = arith.constant 5.000000e-01 : f32
    %111 = vector.broadcast %cst_60 : f32 to vector<8x96xf32>
    %112 = arith.mulf %111, %110 : vector<8x96xf32>
    %cst_61 = arith.constant 5.000000e-01 : f32
    %113 = vector.broadcast %cst_61 : f32 to vector<8x96xf32>
    %114 = arith.addf %112, %113 : vector<8x96xf32>
    %115 = vector.extract_strided_slice %101 {offsets = [0, 96], sizes = [8, 32], strides = [1, 1]} : vector<8x128xf32> to vector<8x32xf32>
    %116 = math.tanh %115 : vector<8x32xf32>
    %117 = vector.extract_strided_slice %114 {offsets = [0, 32], sizes = [8, 32], strides = [1, 1]} : vector<8x96xf32> to vector<8x32xf32>
    %118 = arith.mulf %117, %70 : vector<8x32xf32>
    %119 = vector.extract_strided_slice %114 {offsets = [0, 0], sizes = [8, 32], strides = [1, 1]} : vector<8x96xf32> to vector<8x32xf32>
    %120 = arith.mulf %119, %116 : vector<8x32xf32>
    %121 = arith.addf %118, %120 : vector<8x32xf32>
    %122 = vector.extract_strided_slice %114 {offsets = [0, 64], sizes = [8, 32], strides = [1, 1]} : vector<8x96xf32> to vector<8x32xf32>
    %123 = math.tanh %121 : vector<8x32xf32>
    %124 = arith.mulf %122, %123 : vector<8x32xf32>
    %125 = vector.extract_strided_slice %106 {offsets = [0, 0], sizes = [8, 96], strides = [1, 1]} : vector<8x128xf32> to vector<8x96xf32>
    %cst_62 = arith.constant 5.000000e-01 : f32
    %126 = vector.broadcast %cst_62 : f32 to vector<8x96xf32>
    %127 = arith.mulf %126, %125 : vector<8x96xf32>
    %128 = math.tanh %127 : vector<8x96xf32>
    %cst_63 = arith.constant 5.000000e-01 : f32
    %129 = vector.broadcast %cst_63 : f32 to vector<8x96xf32>
    %130 = arith.mulf %129, %128 : vector<8x96xf32>
    %cst_64 = arith.constant 5.000000e-01 : f32
    %131 = vector.broadcast %cst_64 : f32 to vector<8x96xf32>
    %132 = arith.addf %130, %131 : vector<8x96xf32>
    %133 = vector.extract_strided_slice %106 {offsets = [0, 96], sizes = [8, 32], strides = [1, 1]} : vector<8x128xf32> to vector<8x32xf32>
    %134 = math.tanh %133 : vector<8x32xf32>
    %135 = vector.extract_strided_slice %132 {offsets = [0, 32], sizes = [8, 32], strides = [1, 1]} : vector<8x96xf32> to vector<8x32xf32>
    %136 = arith.mulf %135, %88 : vector<8x32xf32>
    %137 = vector.extract_strided_slice %132 {offsets = [0, 0], sizes = [8, 32], strides = [1, 1]} : vector<8x96xf32> to vector<8x32xf32>
    %138 = arith.mulf %137, %134 : vector<8x32xf32>
    %139 = arith.addf %136, %138 : vector<8x32xf32>
    %140 = vector.extract_strided_slice %132 {offsets = [0, 64], sizes = [8, 32], strides = [1, 1]} : vector<8x96xf32> to vector<8x32xf32>
    %141 = math.tanh %139 : vector<8x32xf32>
    %142 = arith.mulf %140, %141 : vector<8x32xf32>
    %c2_i32 = arith.constant 2 : i32
    %c8_i32_65 = arith.constant 8 : i32
    %143 = arith.muli %c2_i32, %c8_i32_65 : i32
    %144 = tpu.assume_multiple %143, 8 : i32
    %c3_i32_66 = arith.constant 3 : i32
    %145 = arith.subi %c3_i32_66, %c2_i32 : i32
    %c8_i32_67 = arith.constant 8 : i32
    %146 = arith.muli %145, %c8_i32_67 : i32
    %147 = tpu.assume_multiple %146, 8 : i32
    %148 = arith.index_cast %144 : i32 to index
    %c0_68 = arith.constant 0 : index
    %149 = vector.load %arg10[%148, %c0_68] : memref<32x128xf32, #tpu.memory_space<vmem>>, vector<8x128xf32>
    %150 = arith.truncf %124 : vector<8x32xf32> to vector<8x32xbf16>
    %cst_69 = arith.constant dense<0.000000e+00> : vector<8x128xf32>
    %151 = tpu.matmul %150, %30, %cst_69 {dimension_numbers = #tpu.dot_dimension_numbers<[1], [0], [0], [1], [0, 0, 1, 1], [], []>} : vector<8x32xbf16>, vector<32x128xbf16>, vector<8x128xf32> -> vector<8x128xf32>
    %152 = arith.addf %149, %151 : vector<8x128xf32>
    %153 = arith.index_cast %147 : i32 to index
    %c0_70 = arith.constant 0 : index
    %154 = vector.load %arg11[%153, %c0_70] : memref<32x128xf32, #tpu.memory_space<vmem>>, vector<8x128xf32>
    %155 = arith.truncf %142 : vector<8x32xf32> to vector<8x32xbf16>
    %cst_71 = arith.constant dense<0.000000e+00> : vector<8x128xf32>
    %156 = tpu.matmul %155, %32, %cst_71 {dimension_numbers = #tpu.dot_dimension_numbers<[1], [0], [0], [1], [0, 0, 1, 1], [], []>} : vector<8x32xbf16>, vector<32x128xbf16>, vector<8x128xf32> -> vector<8x128xf32>
    %157 = arith.addf %154, %156 : vector<8x128xf32>
    %158 = vector.extract_strided_slice %152 {offsets = [0, 0], sizes = [8, 96], strides = [1, 1]} : vector<8x128xf32> to vector<8x96xf32>
    %cst_72 = arith.constant 5.000000e-01 : f32
    %159 = vector.broadcast %cst_72 : f32 to vector<8x96xf32>
    %160 = arith.mulf %159, %158 : vector<8x96xf32>
    %161 = math.tanh %160 : vector<8x96xf32>
    %cst_73 = arith.constant 5.000000e-01 : f32
    %162 = vector.broadcast %cst_73 : f32 to vector<8x96xf32>
    %163 = arith.mulf %162, %161 : vector<8x96xf32>
    %cst_74 = arith.constant 5.000000e-01 : f32
    %164 = vector.broadcast %cst_74 : f32 to vector<8x96xf32>
    %165 = arith.addf %163, %164 : vector<8x96xf32>
    %166 = vector.extract_strided_slice %152 {offsets = [0, 96], sizes = [8, 32], strides = [1, 1]} : vector<8x128xf32> to vector<8x32xf32>
    %167 = math.tanh %166 : vector<8x32xf32>
    %168 = vector.extract_strided_slice %165 {offsets = [0, 32], sizes = [8, 32], strides = [1, 1]} : vector<8x96xf32> to vector<8x32xf32>
    %169 = arith.mulf %168, %121 : vector<8x32xf32>
    %170 = vector.extract_strided_slice %165 {offsets = [0, 0], sizes = [8, 32], strides = [1, 1]} : vector<8x96xf32> to vector<8x32xf32>
    %171 = arith.mulf %170, %167 : vector<8x32xf32>
    %172 = arith.addf %169, %171 : vector<8x32xf32>
    %173 = vector.extract_strided_slice %165 {offsets = [0, 64], sizes = [8, 32], strides = [1, 1]} : vector<8x96xf32> to vector<8x32xf32>
    %174 = math.tanh %172 : vector<8x32xf32>
    %175 = arith.mulf %173, %174 : vector<8x32xf32>
    %176 = vector.extract_strided_slice %157 {offsets = [0, 0], sizes = [8, 96], strides = [1, 1]} : vector<8x128xf32> to vector<8x96xf32>
    %cst_75 = arith.constant 5.000000e-01 : f32
    %177 = vector.broadcast %cst_75 : f32 to vector<8x96xf32>
    %178 = arith.mulf %177, %176 : vector<8x96xf32>
    %179 = math.tanh %178 : vector<8x96xf32>
    %cst_76 = arith.constant 5.000000e-01 : f32
    %180 = vector.broadcast %cst_76 : f32 to vector<8x96xf32>
    %181 = arith.mulf %180, %179 : vector<8x96xf32>
    %cst_77 = arith.constant 5.000000e-01 : f32
    %182 = vector.broadcast %cst_77 : f32 to vector<8x96xf32>
    %183 = arith.addf %181, %182 : vector<8x96xf32>
    %184 = vector.extract_strided_slice %157 {offsets = [0, 96], sizes = [8, 32], strides = [1, 1]} : vector<8x128xf32> to vector<8x32xf32>
    %185 = math.tanh %184 : vector<8x32xf32>
    %186 = vector.extract_strided_slice %183 {offsets = [0, 32], sizes = [8, 32], strides = [1, 1]} : vector<8x96xf32> to vector<8x32xf32>
    %187 = arith.mulf %186, %139 : vector<8x32xf32>
    %188 = vector.extract_strided_slice %183 {offsets = [0, 0], sizes = [8, 32], strides = [1, 1]} : vector<8x96xf32> to vector<8x32xf32>
    %189 = arith.mulf %188, %185 : vector<8x32xf32>
    %190 = arith.addf %187, %189 : vector<8x32xf32>
    %191 = vector.extract_strided_slice %183 {offsets = [0, 64], sizes = [8, 32], strides = [1, 1]} : vector<8x96xf32> to vector<8x32xf32>
    %192 = math.tanh %190 : vector<8x32xf32>
    %193 = arith.mulf %191, %192 : vector<8x32xf32>
    %c3_i32_78 = arith.constant 3 : i32
    %c8_i32_79 = arith.constant 8 : i32
    %194 = arith.muli %c3_i32_78, %c8_i32_79 : i32
    %195 = tpu.assume_multiple %194, 8 : i32
    %c3_i32_80 = arith.constant 3 : i32
    %196 = arith.subi %c3_i32_80, %c3_i32_78 : i32
    %c8_i32_81 = arith.constant 8 : i32
    %197 = arith.muli %196, %c8_i32_81 : i32
    %198 = tpu.assume_multiple %197, 8 : i32
    %199 = arith.index_cast %195 : i32 to index
    %c0_82 = arith.constant 0 : index
    %200 = vector.load %arg10[%199, %c0_82] : memref<32x128xf32, #tpu.memory_space<vmem>>, vector<8x128xf32>
    %201 = arith.truncf %175 : vector<8x32xf32> to vector<8x32xbf16>
    %cst_83 = arith.constant dense<0.000000e+00> : vector<8x128xf32>
    %202 = tpu.matmul %201, %30, %cst_83 {dimension_numbers = #tpu.dot_dimension_numbers<[1], [0], [0], [1], [0, 0, 1, 1], [], []>} : vector<8x32xbf16>, vector<32x128xbf16>, vector<8x128xf32> -> vector<8x128xf32>
    %203 = arith.addf %200, %202 : vector<8x128xf32>
    %204 = arith.index_cast %198 : i32 to index
    %c0_84 = arith.constant 0 : index
    %205 = vector.load %arg11[%204, %c0_84] : memref<32x128xf32, #tpu.memory_space<vmem>>, vector<8x128xf32>
    %206 = arith.truncf %193 : vector<8x32xf32> to vector<8x32xbf16>
    %cst_85 = arith.constant dense<0.000000e+00> : vector<8x128xf32>
    %207 = tpu.matmul %206, %32, %cst_85 {dimension_numbers = #tpu.dot_dimension_numbers<[1], [0], [0], [1], [0, 0, 1, 1], [], []>} : vector<8x32xbf16>, vector<32x128xbf16>, vector<8x128xf32> -> vector<8x128xf32>
    %208 = arith.addf %205, %207 : vector<8x128xf32>
    %209 = vector.extract_strided_slice %203 {offsets = [0, 0], sizes = [8, 96], strides = [1, 1]} : vector<8x128xf32> to vector<8x96xf32>
    %cst_86 = arith.constant 5.000000e-01 : f32
    %210 = vector.broadcast %cst_86 : f32 to vector<8x96xf32>
    %211 = arith.mulf %210, %209 : vector<8x96xf32>
    %212 = math.tanh %211 : vector<8x96xf32>
    %cst_87 = arith.constant 5.000000e-01 : f32
    %213 = vector.broadcast %cst_87 : f32 to vector<8x96xf32>
    %214 = arith.mulf %213, %212 : vector<8x96xf32>
    %cst_88 = arith.constant 5.000000e-01 : f32
    %215 = vector.broadcast %cst_88 : f32 to vector<8x96xf32>
    %216 = arith.addf %214, %215 : vector<8x96xf32>
    %217 = vector.extract_strided_slice %203 {offsets = [0, 96], sizes = [8, 32], strides = [1, 1]} : vector<8x128xf32> to vector<8x32xf32>
    %218 = math.tanh %217 : vector<8x32xf32>
    %219 = vector.extract_strided_slice %216 {offsets = [0, 32], sizes = [8, 32], strides = [1, 1]} : vector<8x96xf32> to vector<8x32xf32>
    %220 = arith.mulf %219, %172 : vector<8x32xf32>
    %221 = vector.extract_strided_slice %216 {offsets = [0, 0], sizes = [8, 32], strides = [1, 1]} : vector<8x96xf32> to vector<8x32xf32>
    %222 = arith.mulf %221, %218 : vector<8x32xf32>
    %223 = arith.addf %220, %222 : vector<8x32xf32>
    %224 = vector.extract_strided_slice %216 {offsets = [0, 64], sizes = [8, 32], strides = [1, 1]} : vector<8x96xf32> to vector<8x32xf32>
    %225 = math.tanh %223 : vector<8x32xf32>
    %226 = arith.mulf %224, %225 : vector<8x32xf32>
    %227 = vector.extract_strided_slice %208 {offsets = [0, 0], sizes = [8, 96], strides = [1, 1]} : vector<8x128xf32> to vector<8x96xf32>
    %cst_89 = arith.constant 5.000000e-01 : f32
    %228 = vector.broadcast %cst_89 : f32 to vector<8x96xf32>
    %229 = arith.mulf %228, %227 : vector<8x96xf32>
    %230 = math.tanh %229 : vector<8x96xf32>
    %cst_90 = arith.constant 5.000000e-01 : f32
    %231 = vector.broadcast %cst_90 : f32 to vector<8x96xf32>
    %232 = arith.mulf %231, %230 : vector<8x96xf32>
    %cst_91 = arith.constant 5.000000e-01 : f32
    %233 = vector.broadcast %cst_91 : f32 to vector<8x96xf32>
    %234 = arith.addf %232, %233 : vector<8x96xf32>
    %235 = vector.extract_strided_slice %208 {offsets = [0, 96], sizes = [8, 32], strides = [1, 1]} : vector<8x128xf32> to vector<8x32xf32>
    %236 = math.tanh %235 : vector<8x32xf32>
    %237 = vector.extract_strided_slice %234 {offsets = [0, 32], sizes = [8, 32], strides = [1, 1]} : vector<8x96xf32> to vector<8x32xf32>
    %238 = arith.mulf %237, %190 : vector<8x32xf32>
    %239 = vector.extract_strided_slice %234 {offsets = [0, 0], sizes = [8, 32], strides = [1, 1]} : vector<8x96xf32> to vector<8x32xf32>
    %240 = arith.mulf %239, %236 : vector<8x32xf32>
    %241 = arith.addf %238, %240 : vector<8x32xf32>
    %242 = vector.extract_strided_slice %234 {offsets = [0, 64], sizes = [8, 32], strides = [1, 1]} : vector<8x96xf32> to vector<8x32xf32>
    %243 = math.tanh %241 : vector<8x32xf32>
    %244 = arith.mulf %242, %243 : vector<8x32xf32>
    %c4_i32 = arith.constant 4 : i32
    %c0_92 = arith.constant 0 : index
    %c0_93 = arith.constant 0 : index
    %c0_94 = arith.constant 0 : index
    %245 = vector.load %arg12[%c0_92, %c0_93, %c0_94] : memref<4x8x32xf32, #tpu.memory_space<vmem>>, vector<1x8x32xf32>
    %246 = vector.shape_cast %245 : vector<1x8x32xf32> to vector<8x32xf32>
    %247 = vector.shape_cast %226 : vector<8x32xf32> to vector<1x8x32xf32>
    tpu.vector_store %arg12[%c0_92, %c0_93, %c0_94], %247 {strides = array<i32>} : memref<4x8x32xf32, #tpu.memory_space<vmem>>, vector<1x8x32xf32>,
    %c1_95 = arith.constant 1 : index
    %c0_96 = arith.constant 0 : index
    %c0_97 = arith.constant 0 : index
    %248 = vector.load %arg12[%c1_95, %c0_96, %c0_97] : memref<4x8x32xf32, #tpu.memory_space<vmem>>, vector<1x8x32xf32>
    %249 = vector.shape_cast %248 : vector<1x8x32xf32> to vector<8x32xf32>
    %250 = vector.shape_cast %223 : vector<8x32xf32> to vector<1x8x32xf32>
    tpu.vector_store %arg12[%c1_95, %c0_96, %c0_97], %250 {strides = array<i32>} : memref<4x8x32xf32, #tpu.memory_space<vmem>>, vector<1x8x32xf32>,
    %c2_98 = arith.constant 2 : index
    %c0_99 = arith.constant 0 : index
    %c0_100 = arith.constant 0 : index
    %251 = vector.load %arg12[%c2_98, %c0_99, %c0_100] : memref<4x8x32xf32, #tpu.memory_space<vmem>>, vector<1x8x32xf32>
    %252 = vector.shape_cast %251 : vector<1x8x32xf32> to vector<8x32xf32>
    %253 = vector.shape_cast %244 : vector<8x32xf32> to vector<1x8x32xf32>
    tpu.vector_store %arg12[%c2_98, %c0_99, %c0_100], %253 {strides = array<i32>} : memref<4x8x32xf32, #tpu.memory_space<vmem>>, vector<1x8x32xf32>,
    %c3_101 = arith.constant 3 : index
    %c0_102 = arith.constant 0 : index
    %c0_103 = arith.constant 0 : index
    %254 = vector.load %arg12[%c3_101, %c0_102, %c0_103] : memref<4x8x32xf32, #tpu.memory_space<vmem>>, vector<1x8x32xf32>
    %255 = vector.shape_cast %254 : vector<1x8x32xf32> to vector<8x32xf32>
    %256 = vector.shape_cast %241 : vector<8x32xf32> to vector<1x8x32xf32>
    tpu.vector_store %arg12[%c3_101, %c0_102, %c0_103], %256 {strides = array<i32>} : memref<4x8x32xf32, #tpu.memory_space<vmem>>, vector<1x8x32xf32>,
    %c1_i32_104 = arith.constant 1 : i32
    %257 = arith.cmpi eq, %arg0, %c1_i32_104 : i32
    %258 = arith.extui %257 : i1 to i32
    %c0_i32_105 = arith.constant 0 : i32
    %259 = arith.cmpi ne, %258, %c0_i32_105 : i32
    scf.if %259 {
      %c0_106 = arith.constant 0 : index
      %c0_107 = arith.constant 0 : index
      %c0_108 = arith.constant 0 : index
      %260 = vector.load %arg8[%c0_106, %c0_107, %c0_108] : memref<2x8x32xf32, #tpu.memory_space<vmem>>, vector<1x8x32xf32>
      %261 = vector.shape_cast %260 : vector<1x8x32xf32> to vector<8x32xf32>
      %262 = vector.shape_cast %226 : vector<8x32xf32> to vector<1x8x32xf32>
      tpu.vector_store %arg8[%c0_106, %c0_107, %c0_108], %262 {strides = array<i32>} : memref<2x8x32xf32, #tpu.memory_space<vmem>>, vector<1x8x32xf32>,
      %c1_109 = arith.constant 1 : index
      %c0_110 = arith.constant 0 : index
      %c0_111 = arith.constant 0 : index
      %263 = vector.load %arg8[%c1_109, %c0_110, %c0_111] : memref<2x8x32xf32, #tpu.memory_space<vmem>>, vector<1x8x32xf32>
      %264 = vector.shape_cast %263 : vector<1x8x32xf32> to vector<8x32xf32>
      %265 = vector.shape_cast %244 : vector<8x32xf32> to vector<1x8x32xf32>
      tpu.vector_store %arg8[%c1_109, %c0_110, %c0_111], %265 {strides = array<i32>} : memref<2x8x32xf32, #tpu.memory_space<vmem>>, vector<1x8x32xf32>,
      %c0_112 = arith.constant 0 : index
      %c0_113 = arith.constant 0 : index
      %c0_114 = arith.constant 0 : index
      %266 = vector.load %arg9[%c0_112, %c0_113, %c0_114] : memref<2x8x32xf32, #tpu.memory_space<vmem>>, vector<1x8x32xf32>
      %267 = vector.shape_cast %266 : vector<1x8x32xf32> to vector<8x32xf32>
      %268 = vector.shape_cast %223 : vector<8x32xf32> to vector<1x8x32xf32>
      tpu.vector_store %arg9[%c0_112, %c0_113, %c0_114], %268 {strides = array<i32>} : memref<2x8x32xf32, #tpu.memory_space<vmem>>, vector<1x8x32xf32>,
      %c1_115 = arith.constant 1 : index
      %c0_116 = arith.constant 0 : index
      %c0_117 = arith.constant 0 : index
      %269 = vector.load %arg9[%c1_115, %c0_116, %c0_117] : memref<2x8x32xf32, #tpu.memory_space<vmem>>, vector<1x8x32xf32>
      %270 = vector.shape_cast %269 : vector<1x8x32xf32> to vector<8x32xf32>
      %271 = vector.shape_cast %241 : vector<8x32xf32> to vector<1x8x32xf32>
      tpu.vector_store %arg9[%c1_115, %c0_116, %c0_117], %271 {strides = array<i32>} : memref<2x8x32xf32, #tpu.memory_space<vmem>>, vector<1x8x32xf32>,
    } else {
    }
    return
  }
  func.func @transform_0(%arg0: i32) -> (i32, i32) {
    %c0_i32 = arith.constant 0 : i32
    %c0_i32_0 = arith.constant 0 : i32
    return %arg0, %c0_i32 : i32, i32
  }
  func.func @transform_1(%arg0: i32) -> (i32, i32) {
    %c0_i32 = arith.constant 0 : i32
    %c0_i32_0 = arith.constant 0 : i32
    return %arg0, %c0_i32 : i32, i32
  }
  func.func @transform_2(%arg0: i32) -> (i32, i32) {
    %c1_i32 = arith.constant 1 : i32
    %0 = arith.subi %c1_i32, %arg0 : i32
    %c0_i32 = arith.constant 0 : i32
    %c0_i32_0 = arith.constant 0 : i32
    return %0, %c0_i32 : i32, i32
  }
  func.func @transform_3(%arg0: i32) -> (i32, i32) {
    %c1_i32 = arith.constant 1 : i32
    %0 = arith.subi %c1_i32, %arg0 : i32
    %c0_i32 = arith.constant 0 : i32
    %c0_i32_0 = arith.constant 0 : i32
    return %0, %c0_i32 : i32, i32
  }
  func.func @transform_4(%arg0: i32) -> (i32, i32, i32) {
    %c0_i32 = arith.constant 0 : i32
    %c0_i32_0 = arith.constant 0 : i32
    %c0_i32_1 = arith.constant 0 : i32
    %c0_i32_2 = arith.constant 0 : i32
    return %c0_i32, %c0_i32_0, %c0_i32_1 : i32, i32, i32
  }
  func.func @transform_5(%arg0: i32) -> (i32, i32, i32) {
    %c0_i32 = arith.constant 0 : i32
    %c0_i32_0 = arith.constant 0 : i32
    %c0_i32_1 = arith.constant 0 : i32
    %c0_i32_2 = arith.constant 0 : i32
    return %c0_i32, %c0_i32_0, %c0_i32_1 : i32, i32, i32
  }
  func.func @transform_6(%arg0: i32) -> (i32, i32) {
    %c0_i32 = arith.constant 0 : i32
    %c0_i32_0 = arith.constant 0 : i32
    %c0_i32_1 = arith.constant 0 : i32
    return %c0_i32, %c0_i32_0 : i32, i32
  }
  func.func @transform_7(%arg0: i32) -> (i32, i32, i32) {
    %c0_i32 = arith.constant 0 : i32
    %c0_i32_0 = arith.constant 0 : i32
    %c0_i32_1 = arith.constant 0 : i32
    %c0_i32_2 = arith.constant 0 : i32
    return %c0_i32, %c0_i32_0, %c0_i32_1 : i32, i32, i32
  }
  func.func @transform_8(%arg0: i32) -> (i32, i32, i32) {
    %c0_i32 = arith.constant 0 : i32
    %c0_i32_0 = arith.constant 0 : i32
    %c0_i32_1 = arith.constant 0 : i32
    %c0_i32_2 = arith.constant 0 : i32
    return %c0_i32, %c0_i32_0, %c0_i32_1 : i32, i32, i32
  }
}

</mosaic_0001>

<bundles_post_ra>
// kernel: encoder_forward.2
= control target key start
LH: loop header
LB: loop body
LE: loop exit
PB: predicated region body
PF: predicated region fallthrough
CT: control target
= control target key end

     0   :  { %s1632_s27 = smov 0   ;;  %s1889_s0 = inlined_call_operand.vmem [shape: f32[64,4], index: 0, kind: input, shape index: {}, may-alias: {0,1}]   ;;  %s1890_s1 = inlined_call_operand.vmem [shape: f32[64,4], index: 1, kind: input, shape index: {}, may-alias: {0,1}]   ;;  %s1891_s2 = inlined_call_operand.vmem [shape: bf16[2,4,128], index: 2, kind: input, shape index: {}]   ;;  %s1892_s3 = inlined_call_operand.vmem [shape: bf16[2,32,128], index: 3, kind: input, shape index: {}]   ;;  %s1893_s4 = inlined_call_operand.vmem [shape: f32[2,128], index: 4, kind: input, shape index: {}]   ;;  %s1894_s5 = inlined_call_operand.vmem [shape: bf16[64,32], index: 5, kind: output, shape index: {0}]   ;;  %s1895_s6 = inlined_call_operand.vmem [shape: bf16[64,32], index: 6, kind: output, shape index: {1}]   ;;  %s1896_s7 = inlined_call_operand.vmem [shape: f32[2,8,32], index: 7, kind: output, shape index: {2}]   ;;  %s1897_s8 = inlined_call_operand.vmem [shape: f32[2,8,32], index: 8, kind: output, shape index: {3}]  }
   0x1 LB: > { %s1638_s28 = sadd.s32 4294967295, %s1579_s27   ;;  %p1339_p0 = scmp.ge.s32.totalorder %s1579_s27, 1  ;;  %s1579_s27 = sphi %s1632_s27, %s19_s27  }
   0x2   : > { %p277_p1 = scmp.lt.s32.totalorder %s1579_s27, 3 }
   0x4   : > { %p278_p2 = pnand %p1339_p0, %p277_p1 }
   0x5   : > { %s1340_s29 = sshll.u32 (!%p278_p2), %s1638_s28, 2  ;;  %s329_s30 = ssub.s32 (!%p278_p2), 1, %s1638_s28 }
   0x6   : > { %281 = sbr.rel (%p278_p2) target bundleno = 2862 (0xb2e), region = 40  ;;  %p324_p3 = scmp.lt.s32.totalorder (!%p278_p2), %s1340_s29, 7 }
   0x7   : > { %s1342_s9 = sshll.u32 (!%p278_p2), %s329_s30, 2  ;;  %p1348_p5 = scmp.ne.s32.totalorder (!%p278_p2), %s1638_s28, 0 }
   0x8   : > { %p331_p4 = scmp.lt.s32.totalorder (!%p278_p2), %s1342_s9, 7 }
   0xd   : > { %s1899_s29 = smov (!%p324_p3, %s1340_s29), 7  ;;  %s1901_s9 = smov (!%p331_p4, %s1342_s9), 7 }
   0xe   : > { %s1341_s10 = sshll.u32 %s1899_s29, 3  ;;  %s1345_s11 = sshll.u32 %s1899_s29, 2  ;;  %vm356_vm0 = vcmask (!%p1348_p5), 261120   ;;  %v1581_v0 = vmov (!%p1348_p5), 0.0  }
   0xf   : > { %s1647_s14 = scalar_lea.vmem %s1889_s0, %s1341_s10  ;;  %s1343_s15 = sshll.u32 %s1901_s9, 3  ;;  %357 = vst.msk [vmem:[#allocation4] sm:$0xff] (!%p1348_p5), %vm356_vm0, %v1581_v0  ;;  %358 = vst.msk [vmem:[#allocation4 + $0x8] sm:$0xff] (!%p1348_p5), %vm356_vm0, %v1581_v0 }
  0x10   : > { %s1652_s18 = scalar_lea.vmem %s1890_s1, %s1343_s15  ;;  %s1657_s21 = scalar_lea.vmem %s1894_s5, %s1345_s11  ;;  %359 = vst.msk [vmem:[#allocation4 + $0x10] sm:$0xff] (!%p1348_p5), %vm356_vm0, %v1581_v0  ;;  %360 = vst.msk [vmem:[#allocation4 + $0x18] sm:$0xff] (!%p1348_p5), %vm356_vm0, %v1581_v0 }
  0x11   : > { %s1347_s22 = sshll.u32 %s1901_s9, 2  ;;  %355 = sbr.rel (%p1348_p5) target bundleno = 24 (0x18), region = 44 }
  0x12   : > { %s1662_s25 = scalar_lea.vmem %s1895_s6, %s1347_s22 }
  0x18 PF: > { %v361_v1 = vld [vmem:[%s1891_s2] sm:$0x3]  ;;  %vm380_vm1 = vcmask 1041408   ;;  %v1352_v2 = vld [vmem:[%s1891_s2 + $0x2] sm:$0x3]  ;;  %v363_v6 = vld [vmem:[%s1647_s14 + $0x8] sm:$0xff] }
  0x19   : > { %v362_v3 = vld [vmem:[%s1647_s14] sm:$0xff]  ;;  %1505 = vmatprep.subr.msk.bf16.mxu0 %vm380_vm1, %v361_v1  ;;  %1506 = vmatprep.subr.msk.bf16.mxu1 %vm380_vm1, %v1352_v2  ;;  %v382_v4 = vsel %vm380_vm1, %v361_v1, 0  ;;  %v457_v5 = vsel %vm380_vm1, %v1352_v2, 0  ;;  %vm373_vm2 = vcmask 31744   ;;  %v440_v8 = vld [vmem:[%s1652_s18 + $0x8] sm:$0xff]  ;;  %v364_v11 = vld [vmem:[%s1647_s14 + $0x10] sm:$0xff] }
  0x1a   : > { %v439_v7 = vld [vmem:[%s1652_s18] sm:$0xff]  ;;  %1430 = vmatpush3.bf16.msra.mxu0 %v382_v4  ;;  %1436 = vmatpush3.bf16.msra.mxu1 %v457_v5  ;;  %v366_v9 = vpack.c.bf16 %v363_v6, %v362_v3  ;;  %v365_v12 = vld [vmem:[%s1647_s14 + $0x18] sm:$0xff]  ;;  %v441_v13 = vld [vmem:[%s1652_s18 + $0x10] sm:$0xff]  ;;  %v1582_v16 = vmov 0.0   ;;  %vm1583_vm3 = vmmov 0   ;;  %vm542_vm4 = vcmask 261120  }
  0x1b   : > { %v443_v10 = vpack.c.bf16 %v440_v8, %v439_v7  ;;  %v367_v14 = vpack.c.bf16 %v365_v12, %v364_v11  ;;  %v442_v15 = vld [vmem:[%s1652_s18 + $0x18] sm:$0xff]  ;;  %1441 = vmatprep.subr.bf16.mxu0 %v1582_v16  ;;  %1449 = vmatprep.subr.bf16.mxu1 %v1582_v16  ;;  %v1686_v18 = vld [vmem:[%s1892_s3] sm:$0xff]   ;;  %v1692_v19 = vld [vmem:[%s1892_s3 + $0x10] sm:$0xff]   ;;  %s1584_s18 = smov 32   ;;  %s1585_s24 = smov 64   ;;  %vm705_vm5 = vcmask 257024  }
  0x1c   : > { %1431 = vmatprep.mubr.msk.bf16.mxu0 %vm373_vm2, %v366_v9  ;;  %v444_v17 = vpack.c.bf16 %v442_v15, %v441_v13  ;;  %v1699_v20 = vld [vmem:[%s1892_s3 + $0x8] sm:$0xff]   ;;  %v1706_v21 = vld [vmem:[%s1892_s3 + $0x18] sm:$0xff]   ;;  %v521_v22 = vld [vmem:[#allocation4] sm:$0xff]  ;;  %s1586_s26 = smov 96   ;;  %p1386_p6 = scmp.ne.s32.totalorder %s1638_s28, 1 }
  0x1d   : > { %1437 = vmatprep.mubr.msk.bf16.mxu1 %vm373_vm2, %v443_v10  ;;  %1432 = vmatmul.mubr.msk.bf16.vlgmr.msra.gmra.mrb[0].mxu0 %vm373_vm2, %v367_v14  ;;  %v525_v23 = vld [vmem:[#allocation4 + $0x10] sm:$0xff]  ;;  %v523_v24 = vld [vmem:[#allocation4 + $0x8] sm:$0xff]  ;;  %v529_v25 = vpack.c.bf16 %v521_v22, %v521_v22  ;;  %v527_v27 = vld [vmem:[#allocation4 + $0x18] sm:$0xff] }
  0x1e   : > { %1438 = vmatmul.mubr.msk.bf16.vlgmr.msra.gmra.mrb[0].mxu1 %vm373_vm2, %v444_v17  ;;  %1442 = vmatpush3.bf16.msra.mxu0 %v1686_v18  ;;  %v589_v26 = vpack.c.bf16 %v525_v23, %v525_v23  ;;  %v1349_v28 = vld [vmem:[%s1893_s4] ss:$0 sm:$0xff]  ;;  %v1353_v29 = vld [vmem:[%s1893_s4 + $0x1] ss:$0 sm:$0xff] }
  0x1f   : > { %1450 = vmatpush3.bf16.msra.mxu1 %v1692_v19  ;;  %1443 = vmatprep.subr.bf16.mxu0 %v1582_v16 }
  0x20   : > { %1451 = vmatprep.subr.bf16.mxu1 %v1582_v16  ;;  %1445 = vmatprep.mubr.msk.bf16.mxu0 %vm1583_vm3, %v1582_v16 }
  0x21   : > { %1453 = vmatprep.mubr.msk.bf16.mxu1 %vm1583_vm3, %v1582_v16  ;;  %652 = vrot.lane.b32.xlu1 %v523_v24, %s1584_s18 }
  0x22   : > { %1444 = vmatpush3.bf16.msra.mxu0 %v1699_v20 }
  0x23   : > { %1452 = vmatpush3.bf16.msra.mxu1 %v1706_v21  ;;  %1457 = vmatprep.subr.bf16.mxu0 %v1582_v16 }
  0x24   : > { %1465 = vmatprep.subr.bf16.mxu1 %v1582_v16 }
  0x25   : > { %1446 = vmatmul.mubr.msk.bf16.vlgmr.msra.gmra.mrb[4].mxu0 %vm542_vm4, %v529_v25  ;;  %678 = vrot.lane.b32.xlu1 %v527_v27, %s1584_s18 }
  0x26   : > { %1454 = vmatmul.mubr.msk.bf16.vlgmr.msra.gmra.mrb[4].mxu1 %vm542_vm4, %v589_v26  ;;  %1458 = vmatpush3.bf16.msra.mxu0 %v1686_v18 }
  0x27   : > { %1459 = vmatprep.subr.bf16.mxu0 %v1582_v16  ;;  %1466 = vmatpush3.bf16.msra.mxu1 %v1692_v19 }
  0x28   : > { %1461 = vmatprep.mubr.msk.bf16.mxu0 %vm1583_vm3, %v1582_v16  ;;  %1467 = vmatprep.subr.bf16.mxu1 %v1582_v16 }
  0x29   : > { %1469 = vmatprep.mubr.msk.bf16.mxu1 %vm1583_vm3, %v1582_v16 }
  0x2a   : > { %1460 = vmatpush3.bf16.msra.mxu0 %v1699_v20 }
  0x2b   : > { %1468 = vmatpush3.bf16.msra.mxu1 %v1706_v21  ;;  %1473 = vmatprep.subr.bf16.mxu0 %v1582_v16 }
  0x2c   : > { %1481 = vmatprep.subr.bf16.mxu1 %v1582_v16 }
  0x93   : > { %v653_v6 = vpop.permute.xlu1 %652 }
  0x97   : > { %v679_v8 = vpop.permute.xlu1 %678 }
  0xf0   : > { %v1433_v30 = vpop.f32.mrb[0].mxu0 }
  0xf1   : > { %v1739_v31 = vadd.f32 %v1433_v30, %v1349_v28  ;;  %v418_v32 = vpop.f32.mrb[1].mxu0  ;;  %v1439_v33 = vpop.f32.mrb[0].mxu1 }
  0xf2   : > { %v1434_v34 = vpop.f32.mrb[2].mxu0  ;;  %v1741_v35 = vadd.f32 %v1439_v33, %v1353_v29  ;;  %v493_v36 = vpop.f32.mrb[1].mxu1  ;;  %v419_v44 = vadd.f32 %v1349_v28, %v418_v32 }
  0xf3   : > { %v1743_v37 = vadd.f32 %v1434_v34, %v1349_v28  ;;  %v421_v38 = vpop.f32.mrb[3].mxu0  ;;  %v1745_v39 = vadd.f32 %v1353_v29, %v493_v36  ;;  %v1440_v40 = vpop.f32.mrb[2].mxu1 }
  0xf4   : > { %v1747_v41 = vadd.f32 %v1349_v28, %v421_v38  ;;  %v496_v42 = vpop.f32.mrb[3].mxu1  ;;  %v505_v45 = vadd.f32 %v1440_v40, %v1353_v29 }
  0xf5   : > { %v1749_v43 = vadd.f32 %v1353_v29, %v496_v42 }
  0xf8   : > { %v580_v46 = vpop.f32.mrb[4].mxu0 }
  0xf9   : > { %v586_v47 = vadd.f32 %v580_v46, %v419_v44  ;;  %v639_v48 = vpop.f32.mrb[4].mxu1  ;;  %v1447_v49 = vpop.f32.mrb[5].mxu0 }
  0xfa   : > { %v645_v50 = vadd.f32 %v639_v48, %v505_v45  ;;  %v583_v51 = vpop.f32.mrb[6].mxu0  ;;  %v1455_v52 = vpop.f32.mrb[5].mxu1 }
  0xfb   : > { %1525 = vtanh.f32 %v586_v47  ;;  %v1448_v53 = vpop.f32.mrb[7].mxu0  ;;  %v642_v54 = vpop.f32.mrb[6].mxu1  ;;  %v646_v58 = vmul.f32 0.5, %v586_v47 }
  0xfc   : > { %v1456_v55 = vpop.f32.mrb[7].mxu1  ;;  %1527 = vtanh.f32 %v645_v50  ;;  %v672_v59 = vmul.f32 0.5, %v645_v50 }
  0xfd   : > { %1529 = vtanh.f32 %v646_v58 }
  0xfe   : > { %1531 = vtanh.f32 %v672_v59 }
 0x105   : > { %v1526_v56 = vpop.eup %1525 }
 0x106   : > { %657 = vrot.lane.b32.xlu0 %v1526_v56, %s1584_s18  ;;  %v1528_v57 = vpop.eup %1527 }
 0x107   : > { %v1530_v60 = vpop.eup %1529 }
 0x108   : > { %v648_v61 = vmul.f32 0.5, %v1530_v60  ;;  %v1532_v62 = vpop.eup %1531 }
 0x109   : > { %v674_v0 = vmul.f32 0.5, %v1532_v62 }
 0x10a   : > { %683 = vrot.lane.b32.xlu0 %v1528_v57, %s1584_s18  ;;  %v649_v63 = vadd.f32 0.5, %v648_v61 }
 0x10b   : > { %v675_v3 = vadd.f32 0.5, %v674_v0 }
 0x10c   : > { %v655_v7 = vmul.f32 %v653_v6, %v649_v63 }
 0x10d   : > { %v681_v11 = vmul.f32 %v679_v8, %v675_v3 }
 0x178   : > { %v658_v1 = vpop.permute.xlu0 %657 }
 0x179   : > { %v660_v2 = vmul.f32 %v658_v1, %v649_v63 }
 0x17b   : > { %662 = vrot.lane.b32.xlu0 %v660_v2, %s1584_s18 }
 0x17c   : > { %v684_v4 = vpop.permute.xlu0 %683 }
 0x17d   : > { %v686_v5 = vmul.f32 %v684_v4, %v675_v3 }
 0x17f   : > { %688 = vrot.lane.b32.xlu1 %v686_v5, %s1584_s18 }
 0x1ed   : > { %v663_v9 = vpop.permute.xlu0 %662 }
 0x1ee   : > { %v1755_v10 = vadd.f32 %v663_v9, %v655_v7 }
 0x1f0   : > { %1533 = vtanh.f32 %v1755_v10 }
 0x1f1   : > { %v689_v12 = vpop.permute.xlu1 %688 }
 0x1f2   : > { %v1758_v13 = vadd.f32 %v689_v12, %v681_v11 }
 0x1f4   : > { %1535 = vtanh.f32 %v1758_v13 }
 0x1fa   : > { %v1534_v14 = vpop.eup %1533 }
 0x1fb   : > { %668 = vrot.lane.b32.xlu0 %v1534_v14, %s1584_s18 }
 0x1fe   : > { %v1536_v15 = vpop.eup %1535 }
 0x1ff   : > { %694 = vrot.lane.b32.xlu1 %v1536_v15, %s1584_s18 }
 0x26d   : > { %v669_v17 = vpop.permute.xlu0 %668 }
 0x26e   : > { %v671_v22 = vmul.f32 %v669_v17, %v649_v63 }
 0x270   : > { %v1763_v23 = vpack.c.bf16 %v671_v22, %v671_v22 }
 0x271   : > { %v695_v24 = vpop.permute.xlu1 %694 }
 0x272   : > { %v697_v25 = vmul.f32 %v695_v24, %v675_v3  ;;  %718 = vrot.lane.b32.xlu0 %v1763_v23, %s1585_s24 }
 0x274   : > { %v1767_v26 = vpack.c.bf16 %v697_v25, %v697_v25 }
 0x276   : > { %766 = vrot.lane.b32.xlu1 %v1767_v26, %s1585_s24 }
 0x2e4   : > { %v719_v27 = vpop.permute.xlu0 %718 }
 0x2e5   : > { %1462 = vmatmul.mubr.msk.bf16.vlgmr.msra.gmra.mrb[8].mxu0 %vm542_vm4, %v719_v27 }
 0x2e6   : > { %1474 = vmatpush3.bf16.msra.mxu0 %v1686_v18  ;;  %1477 = vmatprep.mubr.msk.bf16.mxu0 %vm1583_vm3, %v1582_v16 }
 0x2e7   : > { %1475 = vmatprep.subr.bf16.mxu0 %v1582_v16 }
 0x2e8   : > { %v767_v28 = vpop.permute.xlu1 %766 }
 0x2e9   : > { %1470 = vmatmul.mubr.msk.bf16.vlgmr.msra.gmra.mrb[8].mxu1 %vm542_vm4, %v767_v28 }
 0x2ea   : > { %1476 = vmatpush3.bf16.msra.mxu0 %v1699_v20  ;;  %1482 = vmatpush3.bf16.msra.mxu1 %v1692_v19 }
 0x2eb   : > { %1483 = vmatprep.subr.bf16.mxu1 %v1582_v16  ;;  %1485 = vmatprep.mubr.msk.bf16.mxu1 %vm1583_vm3, %v1582_v16 }
 0x2ec   : > { %1489 = vmatprep.subr.bf16.mxu0 %v1582_v16 }
 0x2ee   : > { %1484 = vmatpush3.bf16.msra.mxu1 %v1706_v21 }
 0x2ef   : > { %1497 = vmatprep.subr.bf16.mxu1 %v1582_v16 }
 0x3b8   : > { %v757_v29 = vpop.f32.mrb[8].mxu0 }
 0x3b9   : > { %v763_v30 = vadd.f32 %v757_v29, %v1747_v41  ;;  %v1463_v32 = vpop.f32.mrb[9].mxu0 }
 0x3ba   : > { %v760_v33 = vpop.f32.mrb[10].mxu0 }
 0x3bb   : > { %1537 = vtanh.f32 %v763_v30  ;;  %v1464_v34 = vpop.f32.mrb[11].mxu0  ;;  %v812_v47 = vmul.f32 0.5, %v763_v30 }
 0x3bc   : > { %v805_v36 = vpop.f32.mrb[8].mxu1 }
 0x3bd   : > { %v811_v38 = vadd.f32 %v805_v36, %v1741_v35  ;;  %v1471_v40 = vpop.f32.mrb[9].mxu1 }
 0x3be   : > { %v808_v42 = vpop.f32.mrb[10].mxu1 }
 0x3bf   : > { %1539 = vtanh.f32 %v811_v38  ;;  %v1472_v44 = vpop.f32.mrb[11].mxu1  ;;  %v834_v41 = vmul.f32 0.5, %v811_v38 }
 0x3c0   : > { %1541 = vtanh.f32 %v812_v47 }
 0x3c1   : > { %1543 = vtanh.f32 %v834_v41 }
 0x3c5   : > { %v1538_v45 = vpop.eup %1537 }
 0x3c6   : > { %819 = vrot.lane.b32.xlu0 %v1538_v45, %s1584_s18 }
 0x3c9   : > { %v1540_v46 = vpop.eup %1539 }
 0x3ca   : > { %841 = vrot.lane.b32.xlu1 %v1540_v46, %s1584_s18  ;;  %v1542_v48 = vpop.eup %1541 }
 0x3cb   : > { %v814_v49 = vmul.f32 0.5, %v1542_v48  ;;  %v1544_v50 = vpop.eup %1543 }
 0x3cc   : > { %v836_v52 = vmul.f32 0.5, %v1544_v50 }
 0x3cd   : > { %v815_v51 = vadd.f32 0.5, %v814_v49 }
 0x3ce   : > { %v837_v54 = vadd.f32 0.5, %v836_v52 }
 0x3cf   : > { %v817_v57 = vmul.f32 %v815_v51, %v1755_v10 }
 0x3d0   : > { %v839_v60 = vmul.f32 %v837_v54, %v1758_v13 }
 0x438   : > { %v820_v35 = vpop.permute.xlu0 %819 }
 0x439   : > { %v822_v53 = vmul.f32 %v820_v35, %v815_v51 }
 0x43b   : > { %824 = vrot.lane.b32.xlu0 %v822_v53, %s1584_s18 }
 0x43c   : > { %v842_v55 = vpop.permute.xlu1 %841 }
 0x43d   : > { %v844_v56 = vmul.f32 %v842_v55, %v837_v54 }
 0x43f   : > { %846 = vrot.lane.b32.xlu1 %v844_v56, %s1584_s18 }
 0x4ad   : > { %v825_v58 = vpop.permute.xlu0 %824 }
 0x4ae   : > { %v827_v59 = vadd.f32 %v825_v58, %v817_v57 }
 0x4b0   : > { %1545 = vtanh.f32 %v827_v59 }
 0x4b1   : > { %v847_v61 = vpop.permute.xlu1 %846 }
 0x4b2   : > { %v849_v62 = vadd.f32 %v847_v61, %v839_v60 }
 0x4b4   : > { %1547 = vtanh.f32 %v849_v62 }
 0x4ba   : > { %v1546_v63 = vpop.eup %1545 }
 0x4bb   : > { %830 = vrot.lane.b32.xlu0 %v1546_v63, %s1584_s18 }
 0x4be   : > { %v1548_v0 = vpop.eup %1547 }
 0x4bf   : > { %852 = vrot.lane.b32.xlu1 %v1548_v0, %s1584_s18 }
 0x52d   : > { %v831_v1 = vpop.permute.xlu0 %830 }
 0x52e   : > { %v833_v2 = vmul.f32 %v831_v1, %v815_v51 }
 0x530   : > { %v1795_v3 = vpack.c.bf16 %v833_v2, %v833_v2 }
 0x531   : > { %v853_v4 = vpop.permute.xlu1 %852 }
 0x532   : > { %v855_v5 = vmul.f32 %v853_v4, %v837_v54  ;;  %876 = vrot.lane.b32.xlu0 %v1795_v3, %s1585_s24 }
 0x534   : > { %v1799_v6 = vpack.c.bf16 %v855_v5, %v855_v5 }
 0x536   : > { %924 = vrot.lane.b32.xlu1 %v1799_v6, %s1585_s24 }
 0x5a4   : > { %v877_v7 = vpop.permute.xlu0 %876 }
 0x5a5   : > { %1478 = vmatmul.mubr.msk.bf16.vlgmr.msra.gmra.mrb[12].mxu0 %vm542_vm4, %v877_v7 }
 0x5a6   : > { %1490 = vmatpush3.bf16.msra.mxu0 %v1686_v18  ;;  %1493 = vmatprep.mubr.msk.bf16.mxu0 %vm1583_vm3, %v1582_v16 }
 0x5a7   : > { %1491 = vmatprep.subr.bf16.mxu0 %v1582_v16 }
 0x5a8   : > { %v925_v8 = vpop.permute.xlu1 %924 }
 0x5a9   : > { %1486 = vmatmul.mubr.msk.bf16.vlgmr.msra.gmra.mrb[12].mxu1 %vm542_vm4, %v925_v8 }
 0x5aa   : > { %1492 = vmatpush3.bf16.msra.mxu0 %v1699_v20  ;;  %1498 = vmatpush3.bf16.msra.mxu1 %v1692_v19 }
 0x5ab   : > { %1499 = vmatprep.subr.bf16.mxu1 %v1582_v16  ;;  %1501 = vmatprep.mubr.msk.bf16.mxu1 %vm1583_vm3, %v1582_v16 }
 0x5ae   : > { %1500 = vmatpush3.bf16.msra.mxu1 %v1706_v21 }
 0x678   : > { %v915_v18 = vpop.f32.mrb[12].mxu0 }
 0x679   : > { %v921_v9 = vadd.f32 %v915_v18, %v1739_v31  ;;  %v1479_v10 = vpop.f32.mrb[13].mxu0 }
 0x67a   : > { %v918_v11 = vpop.f32.mrb[14].mxu0 }
 0x67b   : > { %1549 = vtanh.f32 %v921_v9  ;;  %v1480_v12 = vpop.f32.mrb[15].mxu0  ;;  %v970_v21 = vmul.f32 0.5, %v921_v9 }
 0x67c   : > { %v963_v13 = vpop.f32.mrb[12].mxu1 }
 0x67d   : > { %v969_v14 = vadd.f32 %v963_v13, %v1749_v43  ;;  %v1487_v20 = vpop.f32.mrb[13].mxu1 }
 0x67e   : > { %v966_v15 = vpop.f32.mrb[14].mxu1 }
 0x67f   : > { %1551 = vtanh.f32 %v969_v14  ;;  %v1488_v19 = vpop.f32.mrb[15].mxu1  ;;  %v992_v31 = vmul.f32 0.5, %v969_v14 }
 0x680   : > { %1553 = vtanh.f32 %v970_v21 }
 0x681   : > { %1555 = vtanh.f32 %v992_v31 }
 0x685   : > { %v1550_v17 = vpop.eup %1549 }
 0x686   : > { %977 = vrot.lane.b32.xlu0 %v1550_v17, %s1584_s18 }
 0x689   : > { %v1552_v16 = vpop.eup %1551 }
 0x68a   : > { %999 = vrot.lane.b32.xlu1 %v1552_v16, %s1584_s18  ;;  %v1554_v22 = vpop.eup %1553 }
 0x68b   : > { %v972_v24 = vmul.f32 0.5, %v1554_v22  ;;  %v1556_v25 = vpop.eup %1555 }
 0x68c   : > { %v994_v28 = vmul.f32 0.5, %v1556_v25 }
 0x68d   : > { %v973_v27 = vadd.f32 0.5, %v972_v24 }
 0x68e   : > { %v995_v30 = vadd.f32 0.5, %v994_v28 }
 0x68f   : > { %v975_v34 = vmul.f32 %v973_v27, %v827_v59 }
 0x690   : > { %v997_v40 = vmul.f32 %v995_v30, %v849_v62 }
 0x6f8   : > { %v978_v43 = vpop.permute.xlu0 %977 }
 0x6f9   : > { %v980_v29 = vmul.f32 %v978_v43, %v973_v27 }
 0x6fb   : > { %982 = vrot.lane.b32.xlu0 %v980_v29, %s1584_s18 }
 0x6fc   : > { %v1000_v32 = vpop.permute.xlu1 %999 }
 0x6fd   : > { %v1002_v33 = vmul.f32 %v1000_v32, %v995_v30 }
 0x6ff   : > { %1004 = vrot.lane.b32.xlu1 %v1002_v33, %s1584_s18 }
 0x76d   : > { %v983_v36 = vpop.permute.xlu0 %982 }
 0x76e   : > { %v985_v38 = vadd.f32 %v983_v36, %v975_v34 }
 0x770   : > { %1557 = vtanh.f32 %v985_v38 }
 0x771   : > { %v1005_v42 = vpop.permute.xlu1 %1004 }
 0x772   : > { %v1007_v44 = vadd.f32 %v1005_v42, %v997_v40 }
 0x774   : > { %1559 = vtanh.f32 %v1007_v44 }
 0x77a   : > { %v1558_v45 = vpop.eup %1557 }
 0x77b   : > { %988 = vrot.lane.b32.xlu0 %v1558_v45, %s1584_s18 }
 0x77e   : > { %v1560_v46 = vpop.eup %1559 }
 0x77f   : > { %1010 = vrot.lane.b32.xlu1 %v1560_v46, %s1584_s18 }
 0x7ed   : > { %v989_v47 = vpop.permute.xlu0 %988 }
 0x7ee   : > { %v991_v41 = vmul.f32 %v989_v47, %v973_v27 }
 0x7f0   : > { %v1014_v48 = vpack.c.bf16 %v991_v41, %v991_v41 }
 0x7f1   : > { %v1011_v49 = vpop.permute.xlu1 %1010 }
 0x7f2   : > { %v1013_v50 = vmul.f32 %v1011_v49, %v995_v30  ;;  %1034 = vrot.lane.b32.xlu0 %v1014_v48, %s1585_s24 }
 0x7f4   : > { %v1023_v51 = vpack.c.bf16 %v1013_v50, %v1013_v50 }
 0x7f6   : > { %1081 = vrot.lane.b32.xlu1 %v1023_v51, %s1585_s24 }
 0x864   : > { %v1035_v52 = vpop.permute.xlu0 %1034 }
 0x865   : > { %1494 = vmatmul.mubr.msk.bf16.vlgmr.msra.gmra.mrb[16].mxu0 %vm542_vm4, %v1035_v52 }
 0x868   : > { %v1082_v35 = vpop.permute.xlu1 %1081 }
 0x869   : > { %1502 = vmatmul.mubr.msk.bf16.vlgmr.msra.gmra.mrb[16].mxu1 %vm542_vm4, %v1082_v35 }
 0x938   : > { %v1073_v53 = vpop.f32.mrb[16].mxu0 }
 0x939   : > { %v1079_v54 = vadd.f32 %v1073_v53, %v1743_v37  ;;  %v1495_v55 = vpop.f32.mrb[17].mxu0 }
 0x93a   : > { %v1076_v56 = vpop.f32.mrb[18].mxu0 }
 0x93b   : > { %1561 = vtanh.f32 %v1079_v54  ;;  %v1496_v57 = vpop.f32.mrb[19].mxu0  ;;  %v1127_v1 = vmul.f32 0.5, %v1079_v54 }
 0x93c   : > { %v1120_v58 = vpop.f32.mrb[16].mxu1 }
 0x93d   : > { %v1126_v59 = vadd.f32 %v1120_v58, %v1745_v39  ;;  %v1503_v60 = vpop.f32.mrb[17].mxu1 }
 0x93e   : > { %v1123_v61 = vpop.f32.mrb[18].mxu1 }
 0x93f   : > { %1563 = vtanh.f32 %v1126_v59  ;;  %v1504_v62 = vpop.f32.mrb[19].mxu1  ;;  %v1149_v37 = vmul.f32 0.5, %v1126_v59 }
 0x940   : > { %1565 = vtanh.f32 %v1127_v1 }
 0x941   : > { %1567 = vtanh.f32 %v1149_v37 }
 0x945   : > { %v1562_v63 = vpop.eup %1561 }
 0x946   : > { %1134 = vrot.lane.b32.xlu0 %v1562_v63, %s1584_s18 }
 0x949   : > { %v1564_v0 = vpop.eup %1563 }
 0x94a   : > { %1156 = vrot.lane.b32.xlu1 %v1564_v0, %s1584_s18  ;;  %v1566_v2 = vpop.eup %1565 }
 0x94b   : > { %v1129_v4 = vmul.f32 0.5, %v1566_v2  ;;  %v1568_v5 = vpop.eup %1567 }
 0x94c   : > { %v1151_v8 = vmul.f32 0.5, %v1568_v5 }
 0x94d   : > { %v1130_v7 = vadd.f32 0.5, %v1129_v4 }
 0x94e   : > { %v1152_v9 = vadd.f32 0.5, %v1151_v8 }
 0x94f   : > { %v1132_v12 = vmul.f32 %v1130_v7, %v985_v38 }
 0x950   : > { %v1154_v20 = vmul.f32 %v1152_v9, %v1007_v44 }
 0x9b8   : > { %v1135_v39 = vpop.permute.xlu0 %1134 }
 0x9b9   : > { %v1137_v18 = vmul.f32 %v1135_v39, %v1130_v7 }
 0x9bb   : > { %1139 = vrot.lane.b32.xlu0 %v1137_v18, %s1584_s18 }
 0x9bc   : > { %v1157_v10 = vpop.permute.xlu1 %1156 }
 0x9bd   : > { %v1159_v11 = vmul.f32 %v1157_v10, %v1152_v9 }
 0x9bf   : > { %1161 = vrot.lane.b32.xlu1 %v1159_v11, %s1584_s18 }
 0xa2d   : > { %v1140_v13 = vpop.permute.xlu0 %1139 }
 0xa2e   : > { %v1142_v14 = vadd.f32 %v1140_v13, %v1132_v12 }
 0xa30   : > { %1569 = vtanh.f32 %v1142_v14 }
 0xa31   : > { %v1162_v15 = vpop.permute.xlu1 %1161 }
 0xa32   : > { %v1164_v19 = vadd.f32 %v1162_v15, %v1154_v20 }
 0xa34   : > { %1571 = vtanh.f32 %v1164_v19 }
 0xa3a   : > { %v1570_v17 = vpop.eup %1569 }
 0xa3b   : > { %1145 = vrot.lane.b32.xlu0 %v1570_v17, %s1584_s18 }
 0xa3e   : > { %v1572_v16 = vpop.eup %1571 }
 0xa3f   : > { %1167 = vrot.lane.b32.xlu1 %v1572_v16, %s1584_s18  ;;  %702 = vrot.lane.b32.xlu0 %v1763_v23, %s1585_s24 }
 0xa43   : > { %711 = vrot.lane.b32.xlu1 %v1767_v26, %s1585_s24  ;;  %860 = vrot.lane.b32.xlu0 %v1795_v3, %s1585_s24 }
 0xa47   : > { %869 = vrot.lane.b32.xlu1 %v1799_v6, %s1585_s24  ;;  %1018 = vrot.lane.b32.xlu0 %v1014_v48, %s1585_s24 }
 0xa4b   : > { %1027 = vrot.lane.b32.xlu1 %v1023_v51, %s1585_s24 }
 0xa4f   : > { %1194 = vrot.lane.b32.xlu1 %v1142_v14, %s1586_s26 }
 0xaad   : > { %v1146_v21 = vpop.permute.xlu0 %1145 }
 0xaae   : > { %v1148_v23 = vmul.f32 %v1146_v21, %v1130_v7 }
 0xab0   : > { %1189 = vrot.lane.b32.xlu0 %v1148_v23, %s1585_s24  ;;  %v1397_v31 = vpack.c.bf16 %v1148_v23, %v1148_v23 }
 0xab1   : > { %v1168_v26 = vpop.permute.xlu1 %1167  ;;  %v703_v3 = vpop.permute.xlu0 %702 }
 0xab2   : > { %v1170_v22 = vmul.f32 %v1168_v26, %v1152_v9  ;;  %706 = vst.msk [vmem:[%s1657_s21] sm:$0xf] %vm705_vm5, %v703_v3 }
 0xab4   : > { %v1398_v6 = vpack.c.bf16 %v1170_v22, %v1170_v22  ;;  %1175 = vrot.lane.b32.xlu0 %v1397_v31, %s1585_s24 }
 0xab5   : > { %v712_v24 = vpop.permute.xlu1 %711  ;;  %v861_v25 = vpop.permute.xlu0 %860 }
 0xab6   : > { %1368 = vst.msk [vmem:[%s1662_s25 + $0xc] sm:$0xf] %vm705_vm5, %v712_v24  ;;  %1372 = vst.msk [vmem:[%s1657_s21 + $0x4] sm:$0xf] %vm705_vm5, %v861_v25  ;;  %1184 = vrot.lane.b32.xlu1 %v1398_v6, %s1585_s24 }
 0xab8   : > { %1199 = vrot.lane.b32.xlu0 %v1170_v22, %s1585_s24 }
 0xab9   : > { %v870_v27 = vpop.permute.xlu1 %869  ;;  %v1019_v28 = vpop.permute.xlu0 %1018 }
 0xaba   : > { %1374 = vst.msk [vmem:[%s1662_s25 + $0x8] sm:$0xf] %vm705_vm5, %v870_v27  ;;  %1378 = vst.msk [vmem:[%s1657_s21 + $0x8] sm:$0xf] %vm705_vm5, %v1019_v28  ;;  %1204 = vrot.lane.b32.xlu1 %v1164_v19, %s1586_s26 }
 0xabd   : > { %v1028_v43 = vpop.permute.xlu1 %1027 }
 0xabe   : > { %1380 = vst.msk [vmem:[%s1662_s25 + $0x4] sm:$0xf] %vm705_vm5, %v1028_v43 }
 0xac1   : > { %v1195_v29 = vpop.permute.xlu1 %1194 }
 0xac2   : > { %1197 = vst.msk [vmem:[#allocation4 + $0x8] sm:$0xff] %vm542_vm4, %v1195_v29  ;;  %1215 = vst.msk [vmem:[%s1897_s8] sm:$0xff] (!%p1386_p6), %vm542_vm4, %v1195_v29 }
 0xb22   : > { %v1190_v30 = vpop.permute.xlu0 %1189 }
 0xb23   : > { %1192 = vst.msk [vmem:[#allocation4] sm:$0xff] %vm542_vm4, %v1190_v30  ;;  %1212 = vst.msk [vmem:[%s1896_s7] sm:$0xff] (!%p1386_p6), %vm542_vm4, %v1190_v30 }
 0xb26   : > { %v1176_v32 = vpop.permute.xlu0 %1175 }
 0xb27   : > { %1384 = vst.msk [vmem:[%s1657_s21 + $0xc] sm:$0xf] %vm705_vm5, %v1176_v32  ;;  %1211 = sbr.rel (%p1386_p6) target bundleno = 2862 (0xb2e), region = 48 }
 0xb28   : > { %v1185_v33 = vpop.permute.xlu1 %1184 }
 0xb29   : > { %1187 = vst.msk [vmem:[%s1662_s25] sm:$0xf] %vm705_vm5, %v1185_v33 }
 0xb2a   : > { %v1200_v34 = vpop.permute.xlu0 %1199 }
 0xb2b   : > { %1202 = vst.msk [vmem:[#allocation4 + $0x10] sm:$0xff] %vm542_vm4, %v1200_v34  ;;  %1387 = vst.msk [vmem:[%s1896_s7 + $0x8] sm:$0xff] (!%p1386_p6), %vm542_vm4, %v1200_v34 }
 0xb2c   : > { %v1205_v36 = vpop.permute.xlu1 %1204 }
 0xb2d   : > { %1207 = vst.msk [vmem:[#allocation4 + $0x18] sm:$0xff] %vm542_vm4, %v1205_v36  ;;  %1388 = vst.msk [vmem:[%s1897_s8 + $0x8] sm:$0xff] (!%p1386_p6), %vm542_vm4, %v1205_v36 }
 0xb2e PF: > { %s19_s27 = sadd.s32 1, %s1579_s27  }
 0xb2f   : > { %p16_p7 = scmp.ge.s32.totalorder %s19_s27, 4  }
 0xb31   :  { %18 = sbr.rel (!%p16_p7) target bundleno = 1 (0x1), region = 128 }

// kernel: encoder_forward.3
= control target key start
LH: loop header
LB: loop body
LE: loop exit
PB: predicated region body
PF: predicated region fallthrough
CT: control target
= control target key end

     0   :  { %s1818_s27 = smov 0   ;;  %s2049_s0 = inlined_call_operand.vmem [shape: bf16[64,32], index: 0, kind: input, shape index: {}, may-alias: {0,2}]   ;;  %s2050_s1 = inlined_call_operand.vmem [shape: bf16[64,32], index: 1, kind: input, shape index: {}, may-alias: {1,3}]   ;;  %s2051_s2 = inlined_call_operand.vmem [shape: bf16[64,32], index: 2, kind: input, shape index: {}, may-alias: {0,2}]   ;;  %s2052_s3 = inlined_call_operand.vmem [shape: bf16[64,32], index: 3, kind: input, shape index: {}, may-alias: {1,3}]   ;;  %s2053_s4 = inlined_call_operand.vmem [shape: bf16[2,64,128], index: 4, kind: input, shape index: {}]   ;;  %s2054_s5 = inlined_call_operand.vmem [shape: bf16[2,32,128], index: 5, kind: input, shape index: {}]   ;;  %s2055_s6 = inlined_call_operand.vmem [shape: f32[2,128], index: 6, kind: input, shape index: {}]   ;;  %s2056_s7 = inlined_call_operand.vmem [shape: f32[2,8,32], index: 7, kind: output, shape index: {0}]   ;;  %s2057_s8 = inlined_call_operand.vmem [shape: f32[2,8,32], index: 8, kind: output, shape index: {1}]  }
   0x1 LB: > { %s1824_s28 = sadd.s32 4294967295, %s1765_s27   ;;  %p1468_p0 = scmp.ge.s32.totalorder %s1765_s27, 1  ;;  %s1765_s27 = sphi %s1818_s27, %s19_s27  }
   0x2   : > { %p297_p1 = scmp.lt.s32.totalorder %s1765_s27, 3 }
   0x4   : > { %p298_p2 = pnand %p1468_p0, %p297_p1 }
   0x5   : > { %s1469_s29 = sshll.u32 (!%p298_p2), %s1824_s28, 2  ;;  %s355_s30 = ssub.s32 (!%p298_p2), 1, %s1824_s28 }
   0x6   : > { %301 = sbr.rel (%p298_p2) target bundleno = 2872 (0xb38), region = 48  ;;  %p344_p3 = scmp.lt.s32.totalorder (!%p298_p2), %s1469_s29, 7 }
   0x7   : > { %s1473_s9 = sshll.u32 (!%p298_p2), %s355_s30, 2  ;;  %p1477_p5 = scmp.ne.s32.totalorder (!%p298_p2), %s1824_s28, 0 }
   0x8   : > { %p357_p4 = scmp.lt.s32.totalorder (!%p298_p2), %s1473_s9, 7 }
   0xd   : > { %s2059_s29 = smov (!%p344_p3, %s1469_s29), 7  ;;  %s2061_s9 = smov (!%p357_p4, %s1473_s9), 7 }
   0xe   : > { %s1470_s10 = sshll.u32 %s2059_s29, 2  ;;  %s1474_s17 = sshll.u32 %s2061_s9, 2  ;;  %vm376_vm0 = vcmask (!%p1477_p5), 261120   ;;  %v1767_v0 = vmov (!%p1477_p5), 0.0  }
   0xf   : > { %s1833_s13 = scalar_lea.vmem %s2049_s0, %s1470_s10  ;;  %s353_s16 = scalar_lea.vmem %s2050_s1, %s1470_s10  ;;  %377 = vst.msk [vmem:[#allocation4] sm:$0xff] (!%p1477_p5), %vm376_vm0, %v1767_v0  ;;  %378 = vst.msk [vmem:[#allocation4 + $0x8] sm:$0xff] (!%p1477_p5), %vm376_vm0, %v1767_v0 }
  0x10   : > { %s1841_s20 = scalar_lea.vmem %s2051_s2, %s1474_s17  ;;  %s368_s23 = scalar_lea.vmem %s2052_s3, %s1474_s17  ;;  %379 = vst.msk [vmem:[#allocation4 + $0x10] sm:$0xff] (!%p1477_p5), %vm376_vm0, %v1767_v0  ;;  %380 = vst.msk [vmem:[#allocation4 + $0x18] sm:$0xff] (!%p1477_p5), %vm376_vm0, %v1767_v0 }
  0x11   : > { %375 = sbr.rel (%p1477_p5) target bundleno = 24 (0x18), region = 52 }
  0x18 PF: > { %v1691_v1 = vld [vmem:[%s2053_s4 + $0x10] sm:$0xff]   ;;  %v1693_v3 = vld [vmem:[%s2053_s4 + $0x18] sm:$0xff]   ;;  %vm419_vm1 = vcmask 261120   ;;  %v1695_v5 = vld [vmem:[%s353_s16] sm:$0xff]   ;;  %v1768_v15 = vmov 0.0   ;;  %s1769_s26 = smov 32  }
  0x19   : > { %v1692_v2 = vld [vmem:[%s2053_s4 + $0x30] sm:$0xff]   ;;  %1573 = vmatprep.subr.bf16.mxu0 %v1691_v1  ;;  %v1694_v4 = vld [vmem:[%s2053_s4 + $0x38] sm:$0xff]   ;;  %v1696_v6 = vld [vmem:[%s368_s23] sm:$0xff]   ;;  %1577 = vmatprep.mubr.msk.bf16.mxu0 %vm419_vm1, %v1695_v5  ;;  %vm1770_vm2 = vmmov 0   ;;  %s1771_s14 = smov 64   ;;  %s1772_s15 = smov 96  }
  0x1a   : > { %1589 = vmatprep.subr.bf16.mxu1 %v1692_v2  ;;  %1574 = vmatpush3.bf16.msra.mxu0 %v1691_v1  ;;  %v1697_v7 = vld [vmem:[%s353_s16 + $0x8] sm:$0xff]   ;;  %v1698_v8 = vld [vmem:[%s2053_s4] sm:$0xff]   ;;  %v1891_v19 = vld [vmem:[%s2054_s5 + $0x10] sm:$0xff]   ;;  %p1528_p6 = scmp.ne.s32.totalorder %s1824_s28, 1 }
  0x1b   : > { %1590 = vmatpush3.bf16.msra.mxu1 %v1692_v2  ;;  %1575 = vmatprep.subr.bf16.mxu0 %v1693_v3  ;;  %v1699_v9 = vld [vmem:[%s368_s23 + $0x8] sm:$0xff]   ;;  %v1700_v10 = vld [vmem:[%s2053_s4 + $0x20] sm:$0xff]   ;;  %v764_v23 = vld [vmem:[#allocation4 + $0x18] sm:$0xff] }
  0x1c   : > { %1591 = vmatprep.subr.bf16.mxu1 %v1694_v4  ;;  %1593 = vmatprep.mubr.msk.bf16.mxu1 %vm419_vm1, %v1696_v6  ;;  %v1701_v11 = vld [vmem:[%s2053_s4 + $0x8] sm:$0xff]   ;;  %v1703_v13 = vld [vmem:[%s1833_s13] sm:$0xff]   ;;  %v1907_v24 = vld [vmem:[%s2054_s5 + $0x18] sm:$0xff]  }
  0x1d   : > { %v1702_v12 = vld [vmem:[%s2053_s4 + $0x28] sm:$0xff]   ;;  %v1704_v14 = vld [vmem:[%s1841_s20] sm:$0xff]   ;;  %v762_v25 = vld [vmem:[#allocation4 + $0x10] sm:$0xff] }
  0x1e   : > { %1576 = vmatpush3.bf16.msra.mxu0 %v1693_v3  ;;  %v1705_v16 = vld [vmem:[%s1833_s13 + $0x8] sm:$0xff]   ;;  %v1886_v18 = vld [vmem:[%s2054_s5] sm:$0xff]   ;;  %v825_v27 = vpack.c.bf16 %v762_v25, %v762_v25 }
  0x1f   : > { %1592 = vmatpush3.bf16.msra.mxu1 %v1694_v4  ;;  %1581 = vmatprep.subr.bf16.mxu0 %v1698_v8  ;;  %v1706_v17 = vld [vmem:[%s1841_s20 + $0x8] sm:$0xff]   ;;  %v758_v22 = vld [vmem:[#allocation4] sm:$0xff] }
  0x20   : > { %1597 = vmatprep.subr.bf16.mxu1 %v1700_v10  ;;  %v760_v20 = vld [vmem:[#allocation4 + $0x8] sm:$0xff]  ;;  %v766_v26 = vpack.c.bf16 %v758_v22, %v758_v22  ;;  %v1490_v28 = vld [vmem:[%s2055_s6] ss:$0 sm:$0xff]  ;;  %v1511_v29 = vld [vmem:[%s2055_s6 + $0x1] ss:$0 sm:$0xff] }
  0x21   : > { %1578 = vmatmul.mubr.msk.bf16.vlgmr.msra.gmra.mrb[0].mxu0 %vm419_vm1, %v1697_v7  ;;  %888 = vrot.lane.b32.xlu1 %v760_v20, %s1769_s26  ;;  %v1900_v21 = vld [vmem:[%s2054_s5 + $0x8] sm:$0xff]  }
  0x22   : > { %1594 = vmatmul.mubr.msk.bf16.vlgmr.msra.gmra.mrb[0].mxu1 %vm419_vm1, %v1699_v9  ;;  %1582 = vmatpush3.bf16.msra.mxu0 %v1698_v8 }
  0x23   : > { %1583 = vmatprep.subr.bf16.mxu0 %v1701_v11  ;;  %1598 = vmatpush3.bf16.msra.mxu1 %v1700_v10 }
  0x24   : > { %1599 = vmatprep.subr.bf16.mxu1 %v1702_v12  ;;  %1585 = vmatprep.mubr.msk.bf16.mxu0 %vm419_vm1, %v1703_v13 }
  0x25   : > { %1601 = vmatprep.mubr.msk.bf16.mxu1 %vm419_vm1, %v1704_v14  ;;  %914 = vrot.lane.b32.xlu1 %v764_v23, %s1769_s26 }
  0x26   : > { %1584 = vmatpush3.bf16.msra.mxu0 %v1701_v11 }
  0x27   : > { %1605 = vmatprep.subr.bf16.mxu0 %v1768_v15  ;;  %1600 = vmatpush3.bf16.msra.mxu1 %v1702_v12 }
  0x28   : > { %1613 = vmatprep.subr.bf16.mxu1 %v1768_v15 }
  0x2d   : > { %1586 = vmatmul.mubr.msk.bf16.vlgmr.msra.gmra.mrb[0].mxu0 %vm419_vm1, %v1705_v16 }
  0x2e   : > { %1602 = vmatmul.mubr.msk.bf16.vlgmr.msra.gmra.mrb[0].mxu1 %vm419_vm1, %v1706_v17  ;;  %1606 = vmatpush3.bf16.msra.mxu0 %v1886_v18 }
  0x2f   : > { %1614 = vmatpush3.bf16.msra.mxu1 %v1891_v19  ;;  %1607 = vmatprep.subr.bf16.mxu0 %v1768_v15 }
  0x30   : > { %1615 = vmatprep.subr.bf16.mxu1 %v1768_v15  ;;  %1609 = vmatprep.mubr.msk.bf16.mxu0 %vm1770_vm2, %v1768_v15 }
  0x31   : > { %1617 = vmatprep.mubr.msk.bf16.mxu1 %vm1770_vm2, %v1768_v15 }
  0x32   : > { %1608 = vmatpush3.bf16.msra.mxu0 %v1900_v21 }
  0x33   : > { %1616 = vmatpush3.bf16.msra.mxu1 %v1907_v24  ;;  %1621 = vmatprep.subr.bf16.mxu0 %v1768_v15 }
  0x34   : > { %1629 = vmatprep.subr.bf16.mxu1 %v1768_v15 }
  0x35   : > { %1610 = vmatmul.mubr.msk.bf16.vlgmr.msra.gmra.mrb[4].mxu0 %vm419_vm1, %v766_v26 }
  0x36   : > { %1618 = vmatmul.mubr.msk.bf16.vlgmr.msra.gmra.mrb[4].mxu1 %vm419_vm1, %v825_v27  ;;  %1622 = vmatpush3.bf16.msra.mxu0 %v1886_v18 }
  0x37   : > { %1623 = vmatprep.subr.bf16.mxu0 %v1768_v15  ;;  %1630 = vmatpush3.bf16.msra.mxu1 %v1891_v19 }
  0x38   : > { %1625 = vmatprep.mubr.msk.bf16.mxu0 %vm1770_vm2, %v1768_v15  ;;  %1631 = vmatprep.subr.bf16.mxu1 %v1768_v15 }
  0x39   : > { %1633 = vmatprep.mubr.msk.bf16.mxu1 %vm1770_vm2, %v1768_v15 }
  0x3a   : > { %1624 = vmatpush3.bf16.msra.mxu0 %v1900_v21 }
  0x3b   : > { %1632 = vmatpush3.bf16.msra.mxu1 %v1907_v24  ;;  %1637 = vmatprep.subr.bf16.mxu0 %v1768_v15 }
  0x3c   : > { %1645 = vmatprep.subr.bf16.mxu1 %v1768_v15 }
  0x93   : > { %v889_v6 = vpop.permute.xlu1 %888 }
  0x97   : > { %v915_v8 = vpop.permute.xlu1 %914 }
 0x100   : > { %v1587_v30 = vpop.f32.mrb[0].mxu0 }
 0x101   : > { %v1939_v31 = vadd.f32 %v1587_v30, %v1490_v28  ;;  %v1603_v32 = vpop.f32.mrb[0].mxu1  ;;  %v537_v33 = vpop.f32.mrb[1].mxu0 }
 0x102   : > { %v1941_v34 = vadd.f32 %v1603_v32, %v1511_v29  ;;  %v721_v35 = vpop.f32.mrb[1].mxu1  ;;  %v1588_v36 = vpop.f32.mrb[2].mxu0  ;;  %v557_v44 = vadd.f32 %v1490_v28, %v537_v33 }
 0x103   : > { %v1943_v37 = vadd.f32 %v1511_v29, %v721_v35  ;;  %v1945_v38 = vadd.f32 %v1588_v36, %v1490_v28  ;;  %v1604_v39 = vpop.f32.mrb[2].mxu1  ;;  %v540_v40 = vpop.f32.mrb[3].mxu0 }
 0x104   : > { %v1947_v41 = vadd.f32 %v1490_v28, %v540_v40  ;;  %v724_v42 = vpop.f32.mrb[3].mxu1  ;;  %v744_v45 = vadd.f32 %v1604_v39, %v1511_v29 }
 0x105   : > { %v1949_v43 = vadd.f32 %v1511_v29, %v724_v42 }
 0x108   : > { %v816_v46 = vpop.f32.mrb[4].mxu0 }
 0x109   : > { %v822_v47 = vadd.f32 %v816_v46, %v557_v44  ;;  %v875_v48 = vpop.f32.mrb[4].mxu1  ;;  %v1611_v49 = vpop.f32.mrb[5].mxu0 }
 0x10a   : > { %v881_v50 = vadd.f32 %v875_v48, %v744_v45  ;;  %v819_v51 = vpop.f32.mrb[6].mxu0  ;;  %v1619_v52 = vpop.f32.mrb[5].mxu1 }
 0x10b   : > { %1711 = vtanh.f32 %v822_v47  ;;  %v1612_v53 = vpop.f32.mrb[7].mxu0  ;;  %v878_v54 = vpop.f32.mrb[6].mxu1  ;;  %v882_v58 = vmul.f32 0.5, %v822_v47 }
 0x10c   : > { %v1620_v55 = vpop.f32.mrb[7].mxu1  ;;  %1713 = vtanh.f32 %v881_v50  ;;  %v908_v59 = vmul.f32 0.5, %v881_v50 }
 0x10d   : > { %1715 = vtanh.f32 %v882_v58 }
 0x10e   : > { %1717 = vtanh.f32 %v908_v59 }
 0x115   : > { %v1712_v56 = vpop.eup %1711 }
 0x116   : > { %893 = vrot.lane.b32.xlu0 %v1712_v56, %s1769_s26  ;;  %v1714_v57 = vpop.eup %1713 }
 0x117   : > { %v1716_v60 = vpop.eup %1715 }
 0x118   : > { %v884_v61 = vmul.f32 0.5, %v1716_v60  ;;  %v1718_v62 = vpop.eup %1717 }
 0x119   : > { %v910_v0 = vmul.f32 0.5, %v1718_v62 }
 0x11a   : > { %919 = vrot.lane.b32.xlu0 %v1714_v57, %s1769_s26  ;;  %v885_v63 = vadd.f32 0.5, %v884_v61 }
 0x11b   : > { %v911_v3 = vadd.f32 0.5, %v910_v0 }
 0x11c   : > { %v891_v7 = vmul.f32 %v889_v6, %v885_v63 }
 0x11d   : > { %v917_v11 = vmul.f32 %v915_v8, %v911_v3 }
 0x188   : > { %v894_v1 = vpop.permute.xlu0 %893 }
 0x189   : > { %v896_v2 = vmul.f32 %v894_v1, %v885_v63 }
 0x18b   : > { %898 = vrot.lane.b32.xlu0 %v896_v2, %s1769_s26 }
 0x18c   : > { %v920_v4 = vpop.permute.xlu0 %919 }
 0x18d   : > { %v922_v5 = vmul.f32 %v920_v4, %v911_v3 }
 0x18f   : > { %924 = vrot.lane.b32.xlu1 %v922_v5, %s1769_s26 }
 0x1fd   : > { %v899_v9 = vpop.permute.xlu0 %898 }
 0x1fe   : > { %v1955_v10 = vadd.f32 %v899_v9, %v891_v7 }
 0x200   : > { %1719 = vtanh.f32 %v1955_v10 }
 0x201   : > { %v925_v12 = vpop.permute.xlu1 %924 }
 0x202   : > { %v1958_v13 = vadd.f32 %v925_v12, %v917_v11 }
 0x204   : > { %1721 = vtanh.f32 %v1958_v13 }
 0x20a   : > { %v1720_v14 = vpop.eup %1719 }
 0x20b   : > { %904 = vrot.lane.b32.xlu0 %v1720_v14, %s1769_s26 }
 0x20e   : > { %v1722_v16 = vpop.eup %1721 }
 0x20f   : > { %930 = vrot.lane.b32.xlu1 %v1722_v16, %s1769_s26 }
 0x27d   : > { %v905_v17 = vpop.permute.xlu0 %904 }
 0x27e   : > { %v907_v20 = vmul.f32 %v905_v17, %v885_v63 }
 0x280   : > { %v936_v22 = vpack.c.bf16 %v907_v20, %v907_v20 }
 0x281   : > { %v931_v23 = vpop.permute.xlu1 %930 }
 0x282   : > { %v933_v25 = vmul.f32 %v931_v23, %v911_v3  ;;  %938 = vrot.lane.b32.xlu0 %v936_v22, %s1771_s14 }
 0x284   : > { %v986_v26 = vpack.c.bf16 %v933_v25, %v933_v25 }
 0x286   : > { %988 = vrot.lane.b32.xlu1 %v986_v26, %s1771_s14 }
 0x2f4   : > { %v939_v27 = vpop.permute.xlu0 %938 }
 0x2f5   : > { %1626 = vmatmul.mubr.msk.bf16.vlgmr.msra.gmra.mrb[8].mxu0 %vm419_vm1, %v939_v27 }
 0x2f6   : > { %1638 = vmatpush3.bf16.msra.mxu0 %v1886_v18  ;;  %1641 = vmatprep.mubr.msk.bf16.mxu0 %vm1770_vm2, %v1768_v15 }
 0x2f7   : > { %1639 = vmatprep.subr.bf16.mxu0 %v1768_v15 }
 0x2f8   : > { %v989_v28 = vpop.permute.xlu1 %988 }
 0x2f9   : > { %1634 = vmatmul.mubr.msk.bf16.vlgmr.msra.gmra.mrb[8].mxu1 %vm419_vm1, %v989_v28 }
 0x2fa   : > { %1640 = vmatpush3.bf16.msra.mxu0 %v1900_v21  ;;  %1646 = vmatpush3.bf16.msra.mxu1 %v1891_v19 }
 0x2fb   : > { %1647 = vmatprep.subr.bf16.mxu1 %v1768_v15  ;;  %1649 = vmatprep.mubr.msk.bf16.mxu1 %vm1770_vm2, %v1768_v15 }
 0x2fc   : > { %1653 = vmatprep.subr.bf16.mxu0 %v1768_v15 }
 0x2fe   : > { %1648 = vmatpush3.bf16.msra.mxu1 %v1907_v24 }
 0x2ff   : > { %1661 = vmatprep.subr.bf16.mxu1 %v1768_v15 }
 0x3c8   : > { %v977_v29 = vpop.f32.mrb[8].mxu0 }
 0x3c9   : > { %v983_v30 = vadd.f32 %v977_v29, %v1947_v41  ;;  %v1627_v32 = vpop.f32.mrb[9].mxu0 }
 0x3ca   : > { %v980_v33 = vpop.f32.mrb[10].mxu0 }
 0x3cb   : > { %1723 = vtanh.f32 %v983_v30  ;;  %v1628_v35 = vpop.f32.mrb[11].mxu0  ;;  %v1034_v47 = vmul.f32 0.5, %v983_v30 }
 0x3cc   : > { %v1027_v36 = vpop.f32.mrb[8].mxu1 }
 0x3cd   : > { %v1033_v39 = vadd.f32 %v1027_v36, %v1941_v34  ;;  %v1635_v40 = vpop.f32.mrb[9].mxu1 }
 0x3ce   : > { %v1030_v42 = vpop.f32.mrb[10].mxu1 }
 0x3cf   : > { %1725 = vtanh.f32 %v1033_v39  ;;  %v1636_v44 = vpop.f32.mrb[11].mxu1  ;;  %v1056_v41 = vmul.f32 0.5, %v1033_v39 }
 0x3d0   : > { %1727 = vtanh.f32 %v1034_v47 }
 0x3d1   : > { %1729 = vtanh.f32 %v1056_v41 }
 0x3d5   : > { %v1724_v45 = vpop.eup %1723 }
 0x3d6   : > { %1041 = vrot.lane.b32.xlu0 %v1724_v45, %s1769_s26 }
 0x3d9   : > { %v1726_v46 = vpop.eup %1725 }
 0x3da   : > { %1063 = vrot.lane.b32.xlu1 %v1726_v46, %s1769_s26  ;;  %v1728_v48 = vpop.eup %1727 }
 0x3db   : > { %v1036_v49 = vmul.f32 0.5, %v1728_v48  ;;  %v1730_v50 = vpop.eup %1729 }
 0x3dc   : > { %v1058_v52 = vmul.f32 0.5, %v1730_v50 }
 0x3dd   : > { %v1037_v51 = vadd.f32 0.5, %v1036_v49 }
 0x3de   : > { %v1059_v54 = vadd.f32 0.5, %v1058_v52 }
 0x3df   : > { %v1039_v57 = vmul.f32 %v1037_v51, %v1955_v10 }
 0x3e0   : > { %v1061_v60 = vmul.f32 %v1059_v54, %v1958_v13 }
 0x448   : > { %v1042_v34 = vpop.permute.xlu0 %1041 }
 0x449   : > { %v1044_v53 = vmul.f32 %v1042_v34, %v1037_v51 }
 0x44b   : > { %1046 = vrot.lane.b32.xlu0 %v1044_v53, %s1769_s26 }
 0x44c   : > { %v1064_v55 = vpop.permute.xlu1 %1063 }
 0x44d   : > { %v1066_v56 = vmul.f32 %v1064_v55, %v1059_v54 }
 0x44f   : > { %1068 = vrot.lane.b32.xlu1 %v1066_v56, %s1769_s26 }
 0x4bd   : > { %v1047_v58 = vpop.permute.xlu0 %1046 }
 0x4be   : > { %v1049_v59 = vadd.f32 %v1047_v58, %v1039_v57 }
 0x4c0   : > { %1731 = vtanh.f32 %v1049_v59 }
 0x4c1   : > { %v1069_v61 = vpop.permute.xlu1 %1068 }
 0x4c2   : > { %v1071_v62 = vadd.f32 %v1069_v61, %v1061_v60 }
 0x4c4   : > { %1733 = vtanh.f32 %v1071_v62 }
 0x4ca   : > { %v1732_v63 = vpop.eup %1731 }
 0x4cb   : > { %1052 = vrot.lane.b32.xlu0 %v1732_v63, %s1769_s26 }
 0x4ce   : > { %v1734_v0 = vpop.eup %1733 }
 0x4cf   : > { %1074 = vrot.lane.b32.xlu1 %v1734_v0, %s1769_s26 }
 0x53d   : > { %v1053_v1 = vpop.permute.xlu0 %1052 }
 0x53e   : > { %v1055_v2 = vmul.f32 %v1053_v1, %v1037_v51 }
 0x540   : > { %v1080_v3 = vpack.c.bf16 %v1055_v2, %v1055_v2 }
 0x541   : > { %v1075_v4 = vpop.permute.xlu1 %1074 }
 0x542   : > { %v1077_v5 = vmul.f32 %v1075_v4, %v1059_v54  ;;  %1082 = vrot.lane.b32.xlu0 %v1080_v3, %s1771_s14 }
 0x544   : > { %v1130_v6 = vpack.c.bf16 %v1077_v5, %v1077_v5 }
 0x546   : > { %1132 = vrot.lane.b32.xlu1 %v1130_v6, %s1771_s14 }
 0x5b4   : > { %v1083_v7 = vpop.permute.xlu0 %1082 }
 0x5b5   : > { %1642 = vmatmul.mubr.msk.bf16.vlgmr.msra.gmra.mrb[12].mxu0 %vm419_vm1, %v1083_v7 }
 0x5b6   : > { %1654 = vmatpush3.bf16.msra.mxu0 %v1886_v18  ;;  %1657 = vmatprep.mubr.msk.bf16.mxu0 %vm1770_vm2, %v1768_v15 }
 0x5b7   : > { %1655 = vmatprep.subr.bf16.mxu0 %v1768_v15 }
 0x5b8   : > { %v1133_v8 = vpop.permute.xlu1 %1132 }
 0x5b9   : > { %1650 = vmatmul.mubr.msk.bf16.vlgmr.msra.gmra.mrb[12].mxu1 %vm419_vm1, %v1133_v8 }
 0x5ba   : > { %1656 = vmatpush3.bf16.msra.mxu0 %v1900_v21  ;;  %1662 = vmatpush3.bf16.msra.mxu1 %v1891_v19 }
 0x5bb   : > { %1663 = vmatprep.subr.bf16.mxu1 %v1768_v15  ;;  %1665 = vmatprep.mubr.msk.bf16.mxu1 %vm1770_vm2, %v1768_v15 }
 0x5be   : > { %1664 = vmatpush3.bf16.msra.mxu1 %v1907_v24 }
 0x688   : > { %v1121_v18 = vpop.f32.mrb[12].mxu0 }
 0x689   : > { %v1127_v9 = vadd.f32 %v1121_v18, %v1939_v31  ;;  %v1643_v10 = vpop.f32.mrb[13].mxu0 }
 0x68a   : > { %v1124_v11 = vpop.f32.mrb[14].mxu0 }
 0x68b   : > { %1735 = vtanh.f32 %v1127_v9  ;;  %v1644_v12 = vpop.f32.mrb[15].mxu0  ;;  %v1178_v24 = vmul.f32 0.5, %v1127_v9 }
 0x68c   : > { %v1171_v13 = vpop.f32.mrb[12].mxu1 }
 0x68d   : > { %v1177_v14 = vadd.f32 %v1171_v13, %v1949_v43  ;;  %v1651_v21 = vpop.f32.mrb[13].mxu1 }
 0x68e   : > { %v1174_v16 = vpop.f32.mrb[14].mxu1 }
 0x68f   : > { %1737 = vtanh.f32 %v1177_v14  ;;  %v1652_v19 = vpop.f32.mrb[15].mxu1  ;;  %v1200_v31 = vmul.f32 0.5, %v1177_v14 }
 0x690   : > { %1739 = vtanh.f32 %v1178_v24 }
 0x691   : > { %1741 = vtanh.f32 %v1200_v31 }
 0x695   : > { %v1736_v17 = vpop.eup %1735 }
 0x696   : > { %1185 = vrot.lane.b32.xlu0 %v1736_v17, %s1769_s26 }
 0x699   : > { %v1738_v15 = vpop.eup %1737 }
 0x69a   : > { %1207 = vrot.lane.b32.xlu1 %v1738_v15, %s1769_s26  ;;  %v1740_v20 = vpop.eup %1739 }
 0x69b   : > { %v1180_v22 = vmul.f32 0.5, %v1740_v20  ;;  %v1742_v23 = vpop.eup %1741 }
 0x69c   : > { %v1202_v26 = vmul.f32 0.5, %v1742_v23 }
 0x69d   : > { %v1181_v25 = vadd.f32 0.5, %v1180_v22 }
 0x69e   : > { %v1203_v28 = vadd.f32 0.5, %v1202_v26 }
 0x69f   : > { %v1183_v32 = vmul.f32 %v1181_v25, %v1049_v59 }
 0x6a0   : > { %v1205_v36 = vmul.f32 %v1203_v28, %v1071_v62 }
 0x708   : > { %v1186_v43 = vpop.permute.xlu0 %1185 }
 0x709   : > { %v1188_v27 = vmul.f32 %v1186_v43, %v1181_v25 }
 0x70b   : > { %1190 = vrot.lane.b32.xlu0 %v1188_v27, %s1769_s26 }
 0x70c   : > { %v1208_v29 = vpop.permute.xlu1 %1207 }
 0x70d   : > { %v1210_v30 = vmul.f32 %v1208_v29, %v1203_v28 }
 0x70f   : > { %1212 = vrot.lane.b32.xlu1 %v1210_v30, %s1769_s26 }
 0x77d   : > { %v1191_v33 = vpop.permute.xlu0 %1190 }
 0x77e   : > { %v1193_v35 = vadd.f32 %v1191_v33, %v1183_v32 }
 0x780   : > { %1743 = vtanh.f32 %v1193_v35 }
 0x781   : > { %v1213_v39 = vpop.permute.xlu1 %1212 }
 0x782   : > { %v1215_v40 = vadd.f32 %v1213_v39, %v1205_v36 }
 0x784   : > { %1745 = vtanh.f32 %v1215_v40 }
 0x78a   : > { %v1744_v42 = vpop.eup %1743 }
 0x78b   : > { %1196 = vrot.lane.b32.xlu0 %v1744_v42, %s1769_s26 }
 0x78e   : > { %v1746_v44 = vpop.eup %1745 }
 0x78f   : > { %1218 = vrot.lane.b32.xlu1 %v1746_v44, %s1769_s26 }
 0x7fd   : > { %v1197_v45 = vpop.permute.xlu0 %1196 }
 0x7fe   : > { %v1199_v46 = vmul.f32 %v1197_v45, %v1181_v25 }
 0x800   : > { %v1224_v47 = vpack.c.bf16 %v1199_v46, %v1199_v46 }
 0x801   : > { %v1219_v41 = vpop.permute.xlu1 %1218 }
 0x802   : > { %v1221_v48 = vmul.f32 %v1219_v41, %v1203_v28  ;;  %1226 = vrot.lane.b32.xlu0 %v1224_v47, %s1771_s14 }
 0x804   : > { %v1273_v49 = vpack.c.bf16 %v1221_v48, %v1221_v48 }
 0x806   : > { %1275 = vrot.lane.b32.xlu1 %v1273_v49, %s1771_s14 }
 0x874   : > { %v1227_v50 = vpop.permute.xlu0 %1226 }
 0x875   : > { %1658 = vmatmul.mubr.msk.bf16.vlgmr.msra.gmra.mrb[16].mxu0 %vm419_vm1, %v1227_v50 }
 0x878   : > { %v1276_v51 = vpop.permute.xlu1 %1275 }
 0x879   : > { %1666 = vmatmul.mubr.msk.bf16.vlgmr.msra.gmra.mrb[16].mxu1 %vm419_vm1, %v1276_v51 }
 0x948   : > { %v1265_v52 = vpop.f32.mrb[16].mxu0 }
 0x949   : > { %v1271_v34 = vadd.f32 %v1265_v52, %v1945_v38  ;;  %v1659_v53 = vpop.f32.mrb[17].mxu0 }
 0x94a   : > { %v1268_v54 = vpop.f32.mrb[18].mxu0 }
 0x94b   : > { %1747 = vtanh.f32 %v1271_v34  ;;  %v1660_v55 = vpop.f32.mrb[19].mxu0  ;;  %v1321_v63 = vmul.f32 0.5, %v1271_v34 }
 0x94c   : > { %v1314_v56 = vpop.f32.mrb[16].mxu1 }
 0x94d   : > { %v1320_v57 = vadd.f32 %v1314_v56, %v1943_v37  ;;  %v1667_v58 = vpop.f32.mrb[17].mxu1 }
 0x94e   : > { %v1317_v59 = vpop.f32.mrb[18].mxu1 }
 0x94f   : > { %1749 = vtanh.f32 %v1320_v57  ;;  %v1668_v60 = vpop.f32.mrb[19].mxu1  ;;  %v1343_v38 = vmul.f32 0.5, %v1320_v57 }
 0x950   : > { %1751 = vtanh.f32 %v1321_v63 }
 0x951   : > { %1753 = vtanh.f32 %v1343_v38 }
 0x955   : > { %v1748_v61 = vpop.eup %1747 }
 0x956   : > { %1328 = vrot.lane.b32.xlu0 %v1748_v61, %s1769_s26 }
 0x959   : > { %v1750_v62 = vpop.eup %1749 }
 0x95a   : > { %1350 = vrot.lane.b32.xlu1 %v1750_v62, %s1769_s26  ;;  %v1752_v0 = vpop.eup %1751 }
 0x95b   : > { %v1323_v1 = vmul.f32 0.5, %v1752_v0  ;;  %v1754_v2 = vpop.eup %1753 }
 0x95c   : > { %v1345_v4 = vmul.f32 0.5, %v1754_v2 }
 0x95d   : > { %v1324_v3 = vadd.f32 0.5, %v1323_v1 }
 0x95e   : > { %v1346_v6 = vadd.f32 0.5, %v1345_v4 }
 0x95f   : > { %v1326_v18 = vmul.f32 %v1324_v3, %v1193_v35 }
 0x960   : > { %v1348_v11 = vmul.f32 %v1346_v6, %v1215_v40 }
 0x9c8   : > { %v1329_v37 = vpop.permute.xlu0 %1328 }
 0x9c9   : > { %v1331_v5 = vmul.f32 %v1329_v37, %v1324_v3 }
 0x9cb   : > { %1333 = vrot.lane.b32.xlu0 %v1331_v5, %s1769_s26 }
 0x9cc   : > { %v1351_v7 = vpop.permute.xlu1 %1350 }
 0x9cd   : > { %v1353_v8 = vmul.f32 %v1351_v7, %v1346_v6 }
 0x9cf   : > { %1355 = vrot.lane.b32.xlu1 %v1353_v8, %s1769_s26 }
 0xa3d   : > { %v1334_v9 = vpop.permute.xlu0 %1333 }
 0xa3e   : > { %v1336_v10 = vadd.f32 %v1334_v9, %v1326_v18 }
 0xa40   : > { %1755 = vtanh.f32 %v1336_v10 }
 0xa41   : > { %v1356_v12 = vpop.permute.xlu1 %1355 }
 0xa42   : > { %v1358_v13 = vadd.f32 %v1356_v12, %v1348_v11 }
 0xa44   : > { %1757 = vtanh.f32 %v1358_v13 }
 0xa4a   : > { %v1756_v14 = vpop.eup %1755 }
 0xa4b   : > { %1339 = vrot.lane.b32.xlu0 %v1756_v14, %s1769_s26 }
 0xa4e   : > { %v1758_v21 = vpop.eup %1757 }
 0xa4f   : > { %1361 = vrot.lane.b32.xlu1 %v1758_v21, %s1769_s26 }
 0xa53   : > { %1371 = vrot.lane.b32.xlu1 %v1336_v10, %s1772_s15 }
 0xa57   : > { %1381 = vrot.lane.b32.xlu1 %v1358_v13, %s1772_s15 }
 0xabd   : > { %v1340_v16 = vpop.permute.xlu0 %1339 }
 0xabe   : > { %v1342_v19 = vmul.f32 %v1340_v16, %v1324_v3 }
 0xac0   : > { %1366 = vrot.lane.b32.xlu0 %v1342_v19, %s1771_s14 }
 0xac1   : > { %v1362_v17 = vpop.permute.xlu1 %1361 }
 0xac2   : > { %v1364_v15 = vmul.f32 %v1362_v17, %v1346_v6 }
 0xac4   : > { %1376 = vrot.lane.b32.xlu0 %v1364_v15, %s1771_s14 }
 0xac5   : > { %v1372_v24 = vpop.permute.xlu1 %1371 }
 0xac6   : > { %1374 = vst.msk [vmem:[#allocation4 + $0x8] sm:$0xff] %vm419_vm1, %v1372_v24  ;;  %1392 = vst.msk [vmem:[%s2057_s8] sm:$0xff] (!%p1528_p6), %vm419_vm1, %v1372_v24 }
 0xac9   : > { %v1382_v31 = vpop.permute.xlu1 %1381 }
 0xaca   : > { %1384 = vst.msk [vmem:[#allocation4 + $0x18] sm:$0xff] %vm419_vm1, %v1382_v31  ;;  %1530 = vst.msk [vmem:[%s2057_s8 + $0x8] sm:$0xff] (!%p1528_p6), %vm419_vm1, %v1382_v31 }
 0xb31   : > { %1388 = sbr.rel (%p1528_p6) target bundleno = 2872 (0xb38), region = 56 }
 0xb32   : > { %v1367_v20 = vpop.permute.xlu0 %1366 }
 0xb33   : > { %1369 = vst.msk [vmem:[#allocation4] sm:$0xff] %vm419_vm1, %v1367_v20  ;;  %1389 = vst.msk [vmem:[%s2056_s7] sm:$0xff] (!%p1528_p6), %vm419_vm1, %v1367_v20 }
 0xb36   : > { %v1377_v22 = vpop.permute.xlu0 %1376 }
 0xb37   : > { %1379 = vst.msk [vmem:[#allocation4 + $0x10] sm:$0xff] %vm419_vm1, %v1377_v22  ;;  %1529 = vst.msk [vmem:[%s2056_s7 + $0x8] sm:$0xff] (!%p1528_p6), %vm419_vm1, %v1377_v22 }
 0xb38 PF: > { %s19_s27 = sadd.s32 1, %s1765_s27  }
 0xb39   : > { %p16_p7 = scmp.ge.s32.totalorder %s19_s27, 4  }
 0xb3b   :  { %18 = sbr.rel (!%p16_p7) target bundleno = 1 (0x1), region = 112 }

</bundles_post_ra>
